<compile_context>
chip_gen: v7x
topology: tpu7x:2x2x1
jax: 0.10.0
libtpu: 0.0.40
codegen_flags: <defaults>
</compile_context>

<pallas_src>
import functools
import math

import numpy as np
import jax
import jax.numpy as jnp
from jax import lax
from jax.experimental import pallas as pl
from jax.experimental.pallas import tpu as pltpu


def _gaussian_1d(window_size: int, sigma: float = 1.5) -> np.ndarray:
    """Matches torch `gaussian`: normalized 1-D gaussian."""
    xs = np.arange(window_size, dtype=np.float64)
    g = np.exp(-((xs - window_size // 2) ** 2) / (2.0 * sigma ** 2))
    return (g / g.sum()).astype(np.float32)


def _band_matrix(n: int, g1d: np.ndarray) -> np.ndarray:
    """M[i, j] = g1d[j - i + pad]; (M @ x) is the zero-padded 'same' 1-D conv."""
    K = g1d.shape[0]
    pad = K // 2
    M = np.zeros((n, n), np.float32)
    for i in range(n):
        for u in range(K):
            j = i + u - pad
            if 0 <= j < n:
                M[i, j] = g1d[u]
    return M


def _split_hi_lo(x_f32):
    """Split f32 into bf16 hi/lo parts (for a manual bf16_3x matmul)."""
    hi = x_f32.astype(jnp.bfloat16)
    lo = (x_f32 - hi.astype(jnp.float32)).astype(jnp.bfloat16)
    return hi, lo


def _dot3x_rc(x, m_hi, m_lo):
    """bf16_3x:  x @ M  with M pre-split; drops only the lo*lo term (~2^-18)."""
    f32 = jnp.float32
    x_hi, x_lo = _split_hi_lo(x)
    out = jnp.dot(x_hi, m_hi, preferred_element_type=f32)
    out = out + jnp.dot(x_hi, m_lo, preferred_element_type=f32)
    out = out + jnp.dot(x_lo, m_hi, preferred_element_type=f32)
    return out


def _dot3x_lc(m_hi, m_lo, x):
    """bf16_3x:  M @ x  with M pre-split."""
    f32 = jnp.float32
    x_hi, x_lo = _split_hi_lo(x)
    out = jnp.dot(m_hi, x_hi, preferred_element_type=f32)
    out = out + jnp.dot(m_lo, x_hi, preferred_element_type=f32)
    out = out + jnp.dot(m_hi, x_lo, preferred_element_type=f32)
    return out


def _ssim_kernel(a_ref, b_ref, rhi_ref, rlo_ref, chi_ref, clo_ref, s_ref,
                 o_ref, x5_ref, yt_ref, *, gb, h, w):
    # a_ref / b_ref : (gb*H, W)     flattened (batch*channel, H) x W slab
    # rhi/rlo       : (H, H)        row-blur band, bf16 hi/lo halves
    # chi/clo       : (W, W)        column-blur band, bf16 hi/lo halves
    # s_ref         : (gb*W, gb)    per-slice lane summation matrix
    # o_ref         : (1, 1, gb)    per-(batch*channel) sums of the ssim map
    # x5_ref        : (5*gb*H, W)   scratch: stacked blur inputs
    # yt_ref        : (H, 5*gb*W)   scratch: re-tiled column-blur outputs
    f32 = jnp.float32
    a = a_ref[...].astype(f32)
    b = b_ref[...].astype(f32)
    n = gb * h

    # Stack the five blur fields along sublanes; products are hoisted out of
    # the blur (conv(a*a) == blur(a2), etc.).
    x5_ref[0 * n:1 * n, :] = a
    x5_ref[1 * n:2 * n, :] = b
    x5_ref[2 * n:3 * n, :] = a * a
    x5_ref[3 * n:4 * n, :] = b * b
    x5_ref[4 * n:5 * n, :] = a * b

    # Column blur: a single (5*gb*H, W) @ (W, W) matmul (bf16_3x).
    y5 = _dot3x_rc(x5_ref[...], chi_ref[...], clo_ref[...])

    # Re-tile every (H, W) chunk into a lane block so the row blur is one
    # exact (H, H) @ (H, 5*gb*W) matmul -- no block-diagonal FLOP waste.
    for j in range(5 * gb):
        yt_ref[:, j * w:(j + 1) * w] = y5[j * h:(j + 1) * h, :]

    z = _dot3x_lc(rhi_ref[...], rlo_ref[...], yt_ref[...])

    gw = gb * w
    mu1 = z[:, 0 * gw:1 * gw]
    mu2 = z[:, 1 * gw:2 * gw]
    s11 = z[:, 2 * gw:3 * gw]
    s22 = z[:, 3 * gw:4 * gw]
    s12 = z[:, 4 * gw:5 * gw]

    mu1_sq = mu1 * mu1
    mu2_sq = mu2 * mu2
    mu1_mu2 = mu1 * mu2
    c1 = 0.01 ** 2
    c2 = 0.03 ** 2
    num = (2.0 * mu1_mu2 + c1) * (2.0 * (s12 - mu1_mu2) + c2)
    den = (mu1_sq + mu2_sq + c1) * ((s11 - mu1_sq) + (s22 - mu2_sq) + c2)

    inv = pl.reciprocal(den, approx=True)      # EUP slot
    inv = inv * (2.0 - den * inv)              # one Newton step -> ~f32 accuracy
    ssim_map = num * inv

    # Per-slice sums: tiny lane contraction (HIGHEST keeps it effectively f32;
    # cost is negligible) + XLU sublane reduce.
    per_rows = jnp.dot(ssim_map, s_ref[...],
                       precision=lax.Precision.HIGHEST,
                       preferred_element_type=f32)            # (H, gb)
    o_ref[...] = jnp.sum(per_rows, axis=0, keepdims=True).reshape(o_ref.shape)


def ssim_pallas(img1, img2, window_size: int = 11, size_average: bool = True):
    """Pallas implementation of SSIM.forward (torch module)."""
    assert img1.shape == img2.shape
    B, C, H, W = img1.shape
    G = B * C
    g1d = _gaussian_1d(window_size, 1.5)

    # ---- per-generation VMEM budget ----
    try:
        vmem_cap = int(pltpu.get_tpu_info().vmem_capacity_bytes)
    except Exception:  # conservative fallback (v7x has 64 MiB per TC)
        vmem_cap = 64 * 1024 * 1024
    vmem_limit = int(0.8 * vmem_cap)

    # ---- choose gb (batch*channel slices per grid step) ----
    itemsize = jnp.dtype(img1.dtype).itemsize
    sub = {4: 8, 2: 16, 1: 32}.get(itemsize, 8)      # dtype-aware sublane packing
    align = sub // math.gcd(H, sub)

    # live-set model in f32 H*W tiles: double-buffered inputs (4), x5 + yt
    # scratch (10), matmul results + hi/lo splits + epilogue temps (~26).
    slice_bytes = 40 * H * W * 4
    gb_vmem = max(1, vmem_limit // slice_bytes)

    gb = max(1, 256 // max(H, 1))              # rows ~ MXU granule
    gb = min(gb, gb_vmem, max(G, 1), 64)
    if G >= 2:
        gb = min(gb, (G + 1) // 2)             # >= 2 grid steps (v7x megacore)
    gb = max(align, (gb // align) * align)

    g_pad = -(-G // gb) * gb
    n_blocks = g_pad // gb
    rows = gb * H

    # ---- constants: banded blur matrices (bf16 hi/lo), per-slice summation ----
    r_f32 = jnp.asarray(_band_matrix(H, g1d))          # left operand (row blur)
    c_f32 = jnp.asarray(_band_matrix(W, g1d).T)        # right operand (col blur)
    r_hi, r_lo = _split_hi_lo(r_f32)
    c_hi, c_lo = _split_hi_lo(c_f32)
    s_np = np.zeros((gb * W, gb), np.float32)
    for s in range(gb):
        s_np[s * W:(s + 1) * W, s] = 1.0
    s_mat = jnp.asarray(s_np)

    # ---- inputs: free flat 2-D slab view, zero-pad to whole blocks ----
    a2d = img1.reshape(G * H, W)
    b2d = img2.reshape(G * H, W)
    if g_pad != G:
        zpad = jnp.zeros(((g_pad - G) * H, W), dtype=a2d.dtype)
        a2d = jnp.concatenate([a2d, zpad], axis=0)
        b2d = jnp.concatenate([b2d, zpad], axis=0)

    kernel = functools.partial(_ssim_kernel, gb=gb, h=H, w=W)

    sums = pl.pallas_call(
        kernel,
        out_shape=jax.ShapeDtypeStruct((n_blocks, 1, gb), jnp.float32),
        grid_spec=pltpu.PrefetchScalarGridSpec(
            num_scalar_prefetch=0,
            grid=(n_blocks,),
            in_specs=[
                pl.BlockSpec((rows, W), lambda i: (i, 0)),      # img1 slab
                pl.BlockSpec((rows, W), lambda i: (i, 0)),      # img2 slab
                pl.BlockSpec((H, H), lambda i: (0, 0)),         # R hi
                pl.BlockSpec((H, H), lambda i: (0, 0)),         # R lo
                pl.BlockSpec((W, W), lambda i: (0, 0)),         # C hi
                pl.BlockSpec((W, W), lambda i: (0, 0)),         # C lo
                pl.BlockSpec((gb * W, gb), lambda i: (0, 0)),   # slice-sum
            ],
            out_specs=pl.BlockSpec((1, 1, gb), lambda i: (i, 0, 0)),
            scratch_shapes=[
                pltpu.VMEM((5 * rows, W), jnp.float32),         # stacked fields
                pltpu.VMEM((H, 5 * gb * W), jnp.float32),       # re-tiled blur
            ]),
        compiler_params=pltpu.CompilerParams(
            dimension_semantics=("parallel",),
            vmem_limit_bytes=vmem_limit),
    )(a2d, b2d, r_hi, r_lo, c_hi, c_lo, s_mat)

    per_slice = sums.reshape(g_pad)[:G]
    hw = jnp.float32(H * W)
    if size_average:
        return jnp.sum(per_slice) / (G * hw)
    # ssim_map.mean(1).mean(1).mean(1) -> per-batch mean over (C, H, W)
    return jnp.sum(per_slice.reshape(B, C), axis=1) / (C * hw)


def ssim_reference(img1, img2, window_size: int = 11, size_average: bool = True):
    """Pure-JAX reference (lax.conv) reproducing torch `_ssim` semantics."""
    B, C, H, W = img1.shape
    K = window_size
    g1d = jnp.asarray(_gaussian_1d(K, 1.5))
    win2d = jnp.outer(g1d, g1d)
    kernel = jnp.broadcast_to(win2d[None, None], (C, 1, K, K))

    def conv(x):
        return lax.conv_general_dilated(
            x.astype(jnp.float32), kernel, window_strides=(1, 1),
            padding=[(K // 2, K // 2), (K // 2, K // 2)],
            dimension_numbers=('NCHW', 'OIHW', 'NCHW'),
            feature_group_count=C,
            precision=lax.Precision.HIGHEST)

    mu1 = conv(img1)
    mu2 = conv(img2)
    mu1_sq, mu2_sq, mu1_mu2 = mu1 ** 2, mu2 ** 2, mu1 * mu2
    sigma1_sq = conv(img1 * img1) - mu1_sq
    sigma2_sq = conv(img2 * img2) - mu2_sq
    sigma12 = conv(img1 * img2) - mu1_mu2
    C1, C2 = 0.01 ** 2, 0.03 ** 2
    ssim_map = ((2 * mu1_mu2 + C1) * (2 * sigma12 + C2) /
                ((mu1_sq + mu2_sq + C1) * (sigma1_sq + sigma2_sq + C2)))
    if size_average:
        return ssim_map.mean()
    return ssim_map.mean(axis=(1, 2, 3))


if __name__ == "__main__":
    key = jax.random.PRNGKey(0)
    k1, k2, k3 = jax.random.split(key, 3)
    B, C, H, W = 2, 4, 16, 16
    img1 = jax.random.uniform(k1, (B, C, H, W), dtype=jnp.float32)
    # Realistic SSIM operating point: img2 is a perturbed copy of img1.
    img2 = jnp.clip(
        img1 + 0.08 * jax.random.normal(k2, (B, C, H, W), jnp.float32), 0.0, 1.0)

    out = jax.block_until_ready(ssim_pallas(img1, img2))
    ref = jax.block_until_ready(ssim_reference(img1, img2))
    assert np.allclose(np.asarray(out), np.asarray(ref), rtol=1e-3, atol=1e-5), (out, ref)

    out_b = jax.block_until_ready(ssim_pallas(img1, img2, size_average=False))
    ref_b = jax.block_until_ready(ssim_reference(img1, img2, size_average=False))
    assert np.allclose(np.asarray(out_b), np.asarray(ref_b), rtol=1e-3, atol=1e-5), (out_b, ref_b)

    # Stress test: independent images (SSIM ~ 5e-3, so the check is dominated
    # by atol; slightly looser to accommodate bf16_3x blur matmuls).
    img3 = jax.random.uniform(k3, (B, C, H, W), dtype=jnp.float32)
    out_i = jax.block_until_ready(ssim_pallas(img1, img3))
    ref_i = jax.block_until_ready(ssim_reference(img1, img3))
    assert np.allclose(np.asarray(out_i), np.asarray(ref_i), rtol=1e-3, atol=1e-4), (out_i, ref_i)

    print("KERNEL_OK")
</pallas_src>

<mosaic_0001>
module attributes {stable_mosaic.version = 11 : i64} {
  func.func @_ssim_kernel(%arg0: i32, %arg1: memref<64x16xf32, #tpu.memory_space<vmem>>, %arg2: memref<64x16xf32, #tpu.memory_space<vmem>>, %arg3: memref<16x16xbf16, #tpu.memory_space<vmem>>, %arg4: memref<16x16xbf16, #tpu.memory_space<vmem>>, %arg5: memref<16x16xbf16, #tpu.memory_space<vmem>>, %arg6: memref<16x16xbf16, #tpu.memory_space<vmem>>, %arg7: memref<64x4xf32, #tpu.memory_space<vmem>>, %arg8: memref<1x1x4xf32, #tpu.memory_space<vmem>>, %arg9: memref<320x16xf32, #tpu.memory_space<vmem>>, %arg10: memref<16x320xf32, #tpu.memory_space<vmem>>) attributes {dimension_semantics = [#tpu.dimension_semantics<parallel>], iteration_bounds = array<i64: 2>, scalar_prefetch = 0 : i64, scratch_operands = 2 : i64, tpu.core_type = #tpu.core_type<tc>, window_params = [{transform_indices = @transform_0, window_bounds = array<i64: 64, 16>}, {transform_indices = @transform_1, window_bounds = array<i64: 64, 16>}, {pipeline_mode = #tpu.pipeline_mode<synchronous>, transform_indices = @transform_2, window_bounds = array<i64: 16, 16>}, {pipeline_mode = #tpu.pipeline_mode<synchronous>, transform_indices = @transform_3, window_bounds = array<i64: 16, 16>}, {pipeline_mode = #tpu.pipeline_mode<synchronous>, transform_indices = @transform_4, window_bounds = array<i64: 16, 16>}, {pipeline_mode = #tpu.pipeline_mode<synchronous>, transform_indices = @transform_5, window_bounds = array<i64: 16, 16>}, {pipeline_mode = #tpu.pipeline_mode<synchronous>, transform_indices = @transform_6, window_bounds = array<i64: 64, 4>}, {transform_indices = @transform_7, window_bounds = array<i64: 1, 1, 4>}]} {
    %c0 = arith.constant 0 : index
    %c0_0 = arith.constant 0 : index
    %0 = vector.load %arg1[%c0, %c0_0] : memref<64x16xf32, #tpu.memory_space<vmem>>, vector<64x16xf32>
    %c0_1 = arith.constant 0 : index
    %c0_2 = arith.constant 0 : index
    %1 = vector.load %arg2[%c0_1, %c0_2] : memref<64x16xf32, #tpu.memory_space<vmem>>, vector<64x16xf32>
    %c0_3 = arith.constant 0 : index
    %c0_4 = arith.constant 0 : index
    %2 = vector.load %arg9[%c0_3, %c0_4] : memref<320x16xf32, #tpu.memory_space<vmem>>, vector<64x16xf32>
    tpu.vector_store %arg9[%c0_3, %c0_4], %0 {strides = array<i32>} : memref<320x16xf32, #tpu.memory_space<vmem>>, vector<64x16xf32>,
    %c64 = arith.constant 64 : index
    %c0_5 = arith.constant 0 : index
    %3 = vector.load %arg9[%c64, %c0_5] : memref<320x16xf32, #tpu.memory_space<vmem>>, vector<64x16xf32>
    tpu.vector_store %arg9[%c64, %c0_5], %1 {strides = array<i32>} : memref<320x16xf32, #tpu.memory_space<vmem>>, vector<64x16xf32>,
    %4 = arith.mulf %0, %0 : vector<64x16xf32>
    %c128 = arith.constant 128 : index
    %c0_6 = arith.constant 0 : index
    %5 = vector.load %arg9[%c128, %c0_6] : memref<320x16xf32, #tpu.memory_space<vmem>>, vector<64x16xf32>
    tpu.vector_store %arg9[%c128, %c0_6], %4 {strides = array<i32>} : memref<320x16xf32, #tpu.memory_space<vmem>>, vector<64x16xf32>,
    %6 = arith.mulf %1, %1 : vector<64x16xf32>
    %c192 = arith.constant 192 : index
    %c0_7 = arith.constant 0 : index
    %7 = vector.load %arg9[%c192, %c0_7] : memref<320x16xf32, #tpu.memory_space<vmem>>, vector<64x16xf32>
    tpu.vector_store %arg9[%c192, %c0_7], %6 {strides = array<i32>} : memref<320x16xf32, #tpu.memory_space<vmem>>, vector<64x16xf32>,
    %8 = arith.mulf %0, %1 : vector<64x16xf32>
    %c256 = arith.constant 256 : index
    %c0_8 = arith.constant 0 : index
    %9 = vector.load %arg9[%c256, %c0_8] : memref<320x16xf32, #tpu.memory_space<vmem>>, vector<64x16xf32>
    tpu.vector_store %arg9[%c256, %c0_8], %8 {strides = array<i32>} : memref<320x16xf32, #tpu.memory_space<vmem>>, vector<64x16xf32>,
    %c0_9 = arith.constant 0 : index
    %c0_10 = arith.constant 0 : index
    %10 = vector.load %arg9[%c0_9, %c0_10] : memref<320x16xf32, #tpu.memory_space<vmem>>, vector<320x16xf32>
    %c0_11 = arith.constant 0 : index
    %c0_12 = arith.constant 0 : index
    %11 = vector.load %arg5[%c0_11, %c0_12] : memref<16x16xbf16, #tpu.memory_space<vmem>>, vector<16x16xbf16>
    %c0_13 = arith.constant 0 : index
    %c0_14 = arith.constant 0 : index
    %12 = vector.load %arg6[%c0_13, %c0_14] : memref<16x16xbf16, #tpu.memory_space<vmem>>, vector<16x16xbf16>
    %13 = arith.truncf %10 : vector<320x16xf32> to vector<320x16xbf16>
    %14 = arith.extf %13 : vector<320x16xbf16> to vector<320x16xf32>
    %15 = arith.subf %10, %14 : vector<320x16xf32>
    %16 = arith.truncf %15 : vector<320x16xf32> to vector<320x16xbf16>
    %cst = arith.constant dense<0.000000e+00> : vector<320x16xf32>
    %17 = tpu.matmul %13, %11, %cst {dimension_numbers = #tpu.dot_dimension_numbers<[1], [0], [0], [1], [0, 0, 1, 1], [], []>} : vector<320x16xbf16>, vector<16x16xbf16>, vector<320x16xf32> -> vector<320x16xf32>
    %cst_15 = arith.constant dense<0.000000e+00> : vector<320x16xf32>
    %18 = tpu.matmul %13, %12, %cst_15 {dimension_numbers = #tpu.dot_dimension_numbers<[1], [0], [0], [1], [0, 0, 1, 1], [], []>} : vector<320x16xbf16>, vector<16x16xbf16>, vector<320x16xf32> -> vector<320x16xf32>
    %19 = arith.addf %17, %18 : vector<320x16xf32>
    %cst_16 = arith.constant dense<0.000000e+00> : vector<320x16xf32>
    %20 = tpu.matmul %16, %11, %cst_16 {dimension_numbers = #tpu.dot_dimension_numbers<[1], [0], [0], [1], [0, 0, 1, 1], [], []>} : vector<320x16xbf16>, vector<16x16xbf16>, vector<320x16xf32> -> vector<320x16xf32>
    %21 = arith.addf %19, %20 : vector<320x16xf32>
    %22 = vector.extract_strided_slice %21 {offsets = [0, 0], sizes = [16, 16], strides = [1, 1]} : vector<320x16xf32> to vector<16x16xf32>
    %c0_17 = arith.constant 0 : index
    %c0_18 = arith.constant 0 : index
    %23 = vector.load %arg10[%c0_17, %c0_18] : memref<16x320xf32, #tpu.memory_space<vmem>>, vector<16x16xf32>
    tpu.vector_store %arg10[%c0_17, %c0_18], %22 {strides = array<i32>} : memref<16x320xf32, #tpu.memory_space<vmem>>, vector<16x16xf32>,
    %24 = vector.extract_strided_slice %21 {offsets = [16, 0], sizes = [16, 16], strides = [1, 1]} : vector<320x16xf32> to vector<16x16xf32>
    %c0_19 = arith.constant 0 : index
    %c16 = arith.constant 16 : index
    %25 = vector.load %arg10[%c0_19, %c16] : memref<16x320xf32, #tpu.memory_space<vmem>>, vector<16x16xf32>
    tpu.vector_store %arg10[%c0_19, %c16], %24 {strides = array<i32>} : memref<16x320xf32, #tpu.memory_space<vmem>>, vector<16x16xf32>,
    %26 = vector.extract_strided_slice %21 {offsets = [32, 0], sizes = [16, 16], strides = [1, 1]} : vector<320x16xf32> to vector<16x16xf32>
    %c0_20 = arith.constant 0 : index
    %c32 = arith.constant 32 : index
    %27 = vector.load %arg10[%c0_20, %c32] : memref<16x320xf32, #tpu.memory_space<vmem>>, vector<16x16xf32>
    tpu.vector_store %arg10[%c0_20, %c32], %26 {strides = array<i32>} : memref<16x320xf32, #tpu.memory_space<vmem>>, vector<16x16xf32>,
    %28 = vector.extract_strided_slice %21 {offsets = [48, 0], sizes = [16, 16], strides = [1, 1]} : vector<320x16xf32> to vector<16x16xf32>
    %c0_21 = arith.constant 0 : index
    %c48 = arith.constant 48 : index
    %29 = vector.load %arg10[%c0_21, %c48] : memref<16x320xf32, #tpu.memory_space<vmem>>, vector<16x16xf32>
    tpu.vector_store %arg10[%c0_21, %c48], %28 {strides = array<i32>} : memref<16x320xf32, #tpu.memory_space<vmem>>, vector<16x16xf32>,
    %30 = vector.extract_strided_slice %21 {offsets = [64, 0], sizes = [16, 16], strides = [1, 1]} : vector<320x16xf32> to vector<16x16xf32>
    %c0_22 = arith.constant 0 : index
    %c64_23 = arith.constant 64 : index
    %31 = vector.load %arg10[%c0_22, %c64_23] : memref<16x320xf32, #tpu.memory_space<vmem>>, vector<16x16xf32>
    tpu.vector_store %arg10[%c0_22, %c64_23], %30 {strides = array<i32>} : memref<16x320xf32, #tpu.memory_space<vmem>>, vector<16x16xf32>,
    %32 = vector.extract_strided_slice %21 {offsets = [80, 0], sizes = [16, 16], strides = [1, 1]} : vector<320x16xf32> to vector<16x16xf32>
    %c0_24 = arith.constant 0 : index
    %c80 = arith.constant 80 : index
    %33 = vector.load %arg10[%c0_24, %c80] : memref<16x320xf32, #tpu.memory_space<vmem>>, vector<16x16xf32>
    tpu.vector_store %arg10[%c0_24, %c80], %32 {strides = array<i32>} : memref<16x320xf32, #tpu.memory_space<vmem>>, vector<16x16xf32>,
    %34 = vector.extract_strided_slice %21 {offsets = [96, 0], sizes = [16, 16], strides = [1, 1]} : vector<320x16xf32> to vector<16x16xf32>
    %c0_25 = arith.constant 0 : index
    %c96 = arith.constant 96 : index
    %35 = vector.load %arg10[%c0_25, %c96] : memref<16x320xf32, #tpu.memory_space<vmem>>, vector<16x16xf32>
    tpu.vector_store %arg10[%c0_25, %c96], %34 {strides = array<i32>} : memref<16x320xf32, #tpu.memory_space<vmem>>, vector<16x16xf32>,
    %36 = vector.extract_strided_slice %21 {offsets = [112, 0], sizes = [16, 16], strides = [1, 1]} : vector<320x16xf32> to vector<16x16xf32>
    %c0_26 = arith.constant 0 : index
    %c112 = arith.constant 112 : index
    %37 = vector.load %arg10[%c0_26, %c112] : memref<16x320xf32, #tpu.memory_space<vmem>>, vector<16x16xf32>
    tpu.vector_store %arg10[%c0_26, %c112], %36 {strides = array<i32>} : memref<16x320xf32, #tpu.memory_space<vmem>>, vector<16x16xf32>,
    %38 = vector.extract_strided_slice %21 {offsets = [128, 0], sizes = [16, 16], strides = [1, 1]} : vector<320x16xf32> to vector<16x16xf32>
    %c0_27 = arith.constant 0 : index
    %c128_28 = arith.constant 128 : index
    %39 = vector.load %arg10[%c0_27, %c128_28] : memref<16x320xf32, #tpu.memory_space<vmem>>, vector<16x16xf32>
    tpu.vector_store %arg10[%c0_27, %c128_28], %38 {strides = array<i32>} : memref<16x320xf32, #tpu.memory_space<vmem>>, vector<16x16xf32>,
    %40 = vector.extract_strided_slice %21 {offsets = [144, 0], sizes = [16, 16], strides = [1, 1]} : vector<320x16xf32> to vector<16x16xf32>
    %c0_29 = arith.constant 0 : index
    %c144 = arith.constant 144 : index
    %41 = vector.load %arg10[%c0_29, %c144] : memref<16x320xf32, #tpu.memory_space<vmem>>, vector<16x16xf32>
    tpu.vector_store %arg10[%c0_29, %c144], %40 {strides = array<i32>} : memref<16x320xf32, #tpu.memory_space<vmem>>, vector<16x16xf32>,
    %42 = vector.extract_strided_slice %21 {offsets = [160, 0], sizes = [16, 16], strides = [1, 1]} : vector<320x16xf32> to vector<16x16xf32>
    %c0_30 = arith.constant 0 : index
    %c160 = arith.constant 160 : index
    %43 = vector.load %arg10[%c0_30, %c160] : memref<16x320xf32, #tpu.memory_space<vmem>>, vector<16x16xf32>
    tpu.vector_store %arg10[%c0_30, %c160], %42 {strides = array<i32>} : memref<16x320xf32, #tpu.memory_space<vmem>>, vector<16x16xf32>,
    %44 = vector.extract_strided_slice %21 {offsets = [176, 0], sizes = [16, 16], strides = [1, 1]} : vector<320x16xf32> to vector<16x16xf32>
    %c0_31 = arith.constant 0 : index
    %c176 = arith.constant 176 : index
    %45 = vector.load %arg10[%c0_31, %c176] : memref<16x320xf32, #tpu.memory_space<vmem>>, vector<16x16xf32>
    tpu.vector_store %arg10[%c0_31, %c176], %44 {strides = array<i32>} : memref<16x320xf32, #tpu.memory_space<vmem>>, vector<16x16xf32>,
    %46 = vector.extract_strided_slice %21 {offsets = [192, 0], sizes = [16, 16], strides = [1, 1]} : vector<320x16xf32> to vector<16x16xf32>
    %c0_32 = arith.constant 0 : index
    %c192_33 = arith.constant 192 : index
    %47 = vector.load %arg10[%c0_32, %c192_33] : memref<16x320xf32, #tpu.memory_space<vmem>>, vector<16x16xf32>
    tpu.vector_store %arg10[%c0_32, %c192_33], %46 {strides = array<i32>} : memref<16x320xf32, #tpu.memory_space<vmem>>, vector<16x16xf32>,
    %48 = vector.extract_strided_slice %21 {offsets = [208, 0], sizes = [16, 16], strides = [1, 1]} : vector<320x16xf32> to vector<16x16xf32>
    %c0_34 = arith.constant 0 : index
    %c208 = arith.constant 208 : index
    %49 = vector.load %arg10[%c0_34, %c208] : memref<16x320xf32, #tpu.memory_space<vmem>>, vector<16x16xf32>
    tpu.vector_store %arg10[%c0_34, %c208], %48 {strides = array<i32>} : memref<16x320xf32, #tpu.memory_space<vmem>>, vector<16x16xf32>,
    %50 = vector.extract_strided_slice %21 {offsets = [224, 0], sizes = [16, 16], strides = [1, 1]} : vector<320x16xf32> to vector<16x16xf32>
    %c0_35 = arith.constant 0 : index
    %c224 = arith.constant 224 : index
    %51 = vector.load %arg10[%c0_35, %c224] : memref<16x320xf32, #tpu.memory_space<vmem>>, vector<16x16xf32>
    tpu.vector_store %arg10[%c0_35, %c224], %50 {strides = array<i32>} : memref<16x320xf32, #tpu.memory_space<vmem>>, vector<16x16xf32>,
    %52 = vector.extract_strided_slice %21 {offsets = [240, 0], sizes = [16, 16], strides = [1, 1]} : vector<320x16xf32> to vector<16x16xf32>
    %c0_36 = arith.constant 0 : index
    %c240 = arith.constant 240 : index
    %53 = vector.load %arg10[%c0_36, %c240] : memref<16x320xf32, #tpu.memory_space<vmem>>, vector<16x16xf32>
    tpu.vector_store %arg10[%c0_36, %c240], %52 {strides = array<i32>} : memref<16x320xf32, #tpu.memory_space<vmem>>, vector<16x16xf32>,
    %54 = vector.extract_strided_slice %21 {offsets = [256, 0], sizes = [16, 16], strides = [1, 1]} : vector<320x16xf32> to vector<16x16xf32>
    %c0_37 = arith.constant 0 : index
    %c256_38 = arith.constant 256 : index
    %55 = vector.load %arg10[%c0_37, %c256_38] : memref<16x320xf32, #tpu.memory_space<vmem>>, vector<16x16xf32>
    tpu.vector_store %arg10[%c0_37, %c256_38], %54 {strides = array<i32>} : memref<16x320xf32, #tpu.memory_space<vmem>>, vector<16x16xf32>,
    %56 = vector.extract_strided_slice %21 {offsets = [272, 0], sizes = [16, 16], strides = [1, 1]} : vector<320x16xf32> to vector<16x16xf32>
    %c0_39 = arith.constant 0 : index
    %c272 = arith.constant 272 : index
    %57 = vector.load %arg10[%c0_39, %c272] : memref<16x320xf32, #tpu.memory_space<vmem>>, vector<16x16xf32>
    tpu.vector_store %arg10[%c0_39, %c272], %56 {strides = array<i32>} : memref<16x320xf32, #tpu.memory_space<vmem>>, vector<16x16xf32>,
    %58 = vector.extract_strided_slice %21 {offsets = [288, 0], sizes = [16, 16], strides = [1, 1]} : vector<320x16xf32> to vector<16x16xf32>
    %c0_40 = arith.constant 0 : index
    %c288 = arith.constant 288 : index
    %59 = vector.load %arg10[%c0_40, %c288] : memref<16x320xf32, #tpu.memory_space<vmem>>, vector<16x16xf32>
    tpu.vector_store %arg10[%c0_40, %c288], %58 {strides = array<i32>} : memref<16x320xf32, #tpu.memory_space<vmem>>, vector<16x16xf32>,
    %60 = vector.extract_strided_slice %21 {offsets = [304, 0], sizes = [16, 16], strides = [1, 1]} : vector<320x16xf32> to vector<16x16xf32>
    %c0_41 = arith.constant 0 : index
    %c304 = arith.constant 304 : index
    %61 = vector.load %arg10[%c0_41, %c304] : memref<16x320xf32, #tpu.memory_space<vmem>>, vector<16x16xf32>
    tpu.vector_store %arg10[%c0_41, %c304], %60 {strides = array<i32>} : memref<16x320xf32, #tpu.memory_space<vmem>>, vector<16x16xf32>,
    %c0_42 = arith.constant 0 : index
    %c0_43 = arith.constant 0 : index
    %62 = vector.load %arg3[%c0_42, %c0_43] : memref<16x16xbf16, #tpu.memory_space<vmem>>, vector<16x16xbf16>
    %c0_44 = arith.constant 0 : index
    %c0_45 = arith.constant 0 : index
    %63 = vector.load %arg4[%c0_44, %c0_45] : memref<16x16xbf16, #tpu.memory_space<vmem>>, vector<16x16xbf16>
    %c0_46 = arith.constant 0 : index
    %c0_47 = arith.constant 0 : index
    %64 = vector.load %arg10[%c0_46, %c0_47] : memref<16x320xf32, #tpu.memory_space<vmem>>, vector<16x320xf32>
    %65 = arith.truncf %64 : vector<16x320xf32> to vector<16x320xbf16>
    %66 = arith.extf %65 : vector<16x320xbf16> to vector<16x320xf32>
    %67 = arith.subf %64, %66 : vector<16x320xf32>
    %68 = arith.truncf %67 : vector<16x320xf32> to vector<16x320xbf16>
    %cst_48 = arith.constant dense<0.000000e+00> : vector<16x320xf32>
    %69 = tpu.matmul %62, %65, %cst_48 {dimension_numbers = #tpu.dot_dimension_numbers<[1], [0], [0], [1], [0, 0, 1, 1], [], []>} : vector<16x16xbf16>, vector<16x320xbf16>, vector<16x320xf32> -> vector<16x320xf32>
    %cst_49 = arith.constant dense<0.000000e+00> : vector<16x320xf32>
    %70 = tpu.matmul %63, %65, %cst_49 {dimension_numbers = #tpu.dot_dimension_numbers<[1], [0], [0], [1], [0, 0, 1, 1], [], []>} : vector<16x16xbf16>, vector<16x320xbf16>, vector<16x320xf32> -> vector<16x320xf32>
    %71 = arith.addf %69, %70 : vector<16x320xf32>
    %cst_50 = arith.constant dense<0.000000e+00> : vector<16x320xf32>
    %72 = tpu.matmul %62, %68, %cst_50 {dimension_numbers = #tpu.dot_dimension_numbers<[1], [0], [0], [1], [0, 0, 1, 1], [], []>} : vector<16x16xbf16>, vector<16x320xbf16>, vector<16x320xf32> -> vector<16x320xf32>
    %73 = arith.addf %71, %72 : vector<16x320xf32>
    %74 = vector.extract_strided_slice %73 {offsets = [0, 0], sizes = [16, 64], strides = [1, 1]} : vector<16x320xf32> to vector<16x64xf32>
    %75 = vector.extract_strided_slice %73 {offsets = [0, 64], sizes = [16, 64], strides = [1, 1]} : vector<16x320xf32> to vector<16x64xf32>
    %76 = vector.extract_strided_slice %73 {offsets = [0, 128], sizes = [16, 64], strides = [1, 1]} : vector<16x320xf32> to vector<16x64xf32>
    %77 = vector.extract_strided_slice %73 {offsets = [0, 192], sizes = [16, 64], strides = [1, 1]} : vector<16x320xf32> to vector<16x64xf32>
    %78 = vector.extract_strided_slice %73 {offsets = [0, 256], sizes = [16, 64], strides = [1, 1]} : vector<16x320xf32> to vector<16x64xf32>
    %79 = arith.mulf %74, %74 : vector<16x64xf32>
    %80 = arith.mulf %75, %75 : vector<16x64xf32>
    %81 = arith.mulf %74, %75 : vector<16x64xf32>
    %cst_51 = arith.constant 2.000000e+00 : f32
    %82 = vector.broadcast %cst_51 : f32 to vector<16x64xf32>
    %83 = arith.mulf %82, %81 : vector<16x64xf32>
    %cst_52 = arith.constant 9.99999974E-5 : f32
    %84 = vector.broadcast %cst_52 : f32 to vector<16x64xf32>
    %85 = arith.addf %83, %84 : vector<16x64xf32>
    %86 = arith.subf %78, %81 : vector<16x64xf32>
    %cst_53 = arith.constant 2.000000e+00 : f32
    %87 = vector.broadcast %cst_53 : f32 to vector<16x64xf32>
    %88 = arith.mulf %87, %86 : vector<16x64xf32>
    %cst_54 = arith.constant 8.99999984E-4 : f32
    %89 = vector.broadcast %cst_54 : f32 to vector<16x64xf32>
    %90 = arith.addf %88, %89 : vector<16x64xf32>
    %91 = arith.mulf %85, %90 : vector<16x64xf32>
    %92 = arith.addf %79, %80 : vector<16x64xf32>
    %cst_55 = arith.constant 9.99999974E-5 : f32
    %93 = vector.broadcast %cst_55 : f32 to vector<16x64xf32>
    %94 = arith.addf %92, %93 : vector<16x64xf32>
    %95 = arith.subf %76, %79 : vector<16x64xf32>
    %96 = arith.subf %77, %80 : vector<16x64xf32>
    %97 = arith.addf %95, %96 : vector<16x64xf32>
    %cst_56 = arith.constant 8.99999984E-4 : f32
    %98 = vector.broadcast %cst_56 : f32 to vector<16x64xf32>
    %99 = arith.addf %97, %98 : vector<16x64xf32>
    %100 = arith.mulf %94, %99 : vector<16x64xf32>
    %101 = tpu.reciprocal %100 {approx = true} : vector<16x64xf32> -> vector<16x64xf32>
    %102 = arith.mulf %100, %101 : vector<16x64xf32>
    %cst_57 = arith.constant 2.000000e+00 : f32
    %103 = vector.broadcast %cst_57 : f32 to vector<16x64xf32>
    %104 = arith.subf %103, %102 : vector<16x64xf32>
    %105 = arith.mulf %101, %104 : vector<16x64xf32>
    %106 = arith.mulf %91, %105 : vector<16x64xf32>
    %c0_58 = arith.constant 0 : index
    %c0_59 = arith.constant 0 : index
    %107 = vector.load %arg7[%c0_58, %c0_59] : memref<64x4xf32, #tpu.memory_space<vmem>>, vector<64x4xf32>
    %cst_60 = arith.constant dense<0.000000e+00> : vector<16x4xf32>
    %108 = tpu.matmul %106, %107, %cst_60 {dimension_numbers = #tpu.dot_dimension_numbers<[1], [0], [0], [1], [0, 0, 1, 1], [], []>, precision = #tpu.contract_precision<fp32>} : vector<16x64xf32>, vector<64x4xf32>, vector<16x4xf32> -> vector<16x4xf32>
    %cst_61 = arith.constant dense<0.000000e+00> : vector<4xf32>
    %109 = vector.multi_reduction <add>, %108, %cst_61 [0] : vector<16x4xf32> to vector<4xf32>
    %110 = vector.shape_cast %109 : vector<4xf32> to vector<1x4xf32>
    %111 = vector.shape_cast %110 : vector<1x4xf32> to vector<1x1x4xf32>
    %c0_62 = arith.constant 0 : index
    %c0_63 = arith.constant 0 : index
    %c0_64 = arith.constant 0 : index
    %112 = vector.load %arg8[%c0_62, %c0_63, %c0_64] : memref<1x1x4xf32, #tpu.memory_space<vmem>>, vector<1x1x4xf32>
    tpu.vector_store %arg8[%c0_62, %c0_63, %c0_64], %111 {strides = array<i32>} : memref<1x1x4xf32, #tpu.memory_space<vmem>>, vector<1x1x4xf32>,
    return
  }
  func.func @transform_0(%arg0: i32) -> (i32, i32) {
    %c0_i32 = arith.constant 0 : i32
    %c0_i32_0 = arith.constant 0 : i32
    return %arg0, %c0_i32 : i32, i32
  }
  func.func @transform_1(%arg0: i32) -> (i32, i32) {
    %c0_i32 = arith.constant 0 : i32
    %c0_i32_0 = arith.constant 0 : i32
    return %arg0, %c0_i32 : i32, i32
  }
  func.func @transform_2(%arg0: i32) -> (i32, i32) {
    %c0_i32 = arith.constant 0 : i32
    %c0_i32_0 = arith.constant 0 : i32
    %c0_i32_1 = arith.constant 0 : i32
    return %c0_i32, %c0_i32_0 : i32, i32
  }
  func.func @transform_3(%arg0: i32) -> (i32, i32) {
    %c0_i32 = arith.constant 0 : i32
    %c0_i32_0 = arith.constant 0 : i32
    %c0_i32_1 = arith.constant 0 : i32
    return %c0_i32, %c0_i32_0 : i32, i32
  }
  func.func @transform_4(%arg0: i32) -> (i32, i32) {
    %c0_i32 = arith.constant 0 : i32
    %c0_i32_0 = arith.constant 0 : i32
    %c0_i32_1 = arith.constant 0 : i32
    return %c0_i32, %c0_i32_0 : i32, i32
  }
  func.func @transform_5(%arg0: i32) -> (i32, i32) {
    %c0_i32 = arith.constant 0 : i32
    %c0_i32_0 = arith.constant 0 : i32
    %c0_i32_1 = arith.constant 0 : i32
    return %c0_i32, %c0_i32_0 : i32, i32
  }
  func.func @transform_6(%arg0: i32) -> (i32, i32) {
    %c0_i32 = arith.constant 0 : i32
    %c0_i32_0 = arith.constant 0 : i32
    %c0_i32_1 = arith.constant 0 : i32
    return %c0_i32, %c0_i32_0 : i32, i32
  }
  func.func @transform_7(%arg0: i32) -> (i32, i32, i32) {
    %c0_i32 = arith.constant 0 : i32
    %c0_i32_0 = arith.constant 0 : i32
    %c0_i32_1 = arith.constant 0 : i32
    return %arg0, %c0_i32, %c0_i32_0 : i32, i32, i32
  }
}

</mosaic_0001>

<bundles_post_ra>
// kernel: tpu_custom_call.1
= control target key start
LH: loop header
LB: loop body
LE: loop exit
PB: predicated region body
PF: predicated region fallthrough
CT: control target
= control target key end

     0   :  { %12 = vsyncpa [#allocation5], 0  ;;  %s4181_s0 = inlined_call_operand.vmem [shape: f32[128,16], index: 0, kind: input, shape index: {}]   ;;  %s4182_s1 = inlined_call_operand.vmem [shape: f32[128,16], index: 1, kind: input, shape index: {}]   ;;  %s4183_s2 = inlined_call_operand.vmem [shape: bf16[16,16], index: 2, kind: input, shape index: {}]   ;;  %s4184_s3 = inlined_call_operand.vmem [shape: bf16[16,16], index: 3, kind: input, shape index: {}]   ;;  %s4185_s4 = inlined_call_operand.vmem [shape: bf16[16,16], index: 4, kind: input, shape index: {}]   ;;  %s4186_s5 = inlined_call_operand.vmem [shape: bf16[16,16], index: 5, kind: input, shape index: {}]   ;;  %s4187_s6 = inlined_call_operand.vmem [shape: f32[64,4], index: 6, kind: input, shape index: {}]   ;;  %s4188_s7 = inlined_call_operand.hbm [shape: f32[2,1,4], index: 7, kind: output, shape index: {}]  }
   0x1   :  { %14 = vsyncpa [#allocation5 + $0x1], 0  ;;  %s3375_s24 = smov 0   ;;  %s3377_s25 = smov 0  }
   0x2   :  { %s3379_s26 = smov 0   ;;  %s3381_s27 = smov 0  }
   0x3 LB: > { %s3396_s28 = sadd.s32 4294967295, %s3322_s27   ;;  %s2531_s29 = sadd.s32 4294967294, %s3322_s27   ;;  %s3322_s27 = sphi %s3381_s27, %s4220_s27   ;;  %s3318_s26 = sphi %s3379_s26, %s4219_s26   ;;  %s3314_s25 = sphi %s3377_s25, %s4218_s25   ;;  %s3310_s24 = sphi %s3375_s24, %s4217_s24  }
   0x4   : > { %s3400_s30 = sadd.s32 1, %s3322_s27   ;;  %s184_s8 = sadd.s32 1, %s3318_s26 }
   0x5   : > { %s181_s9 = ssub.s32 %s3322_s27, %s3400_s30  ;;  %p194_p0 = scmp.ne.s32.totalorder %s3318_s26, %s3314_s25 }
   0x6   : > { %p182_p1 = scmp.eq.s32.totalorder %s181_s9, 0  ;;  %p195_p2 = scmp.eq.s32.totalorder %s3396_s28, 1 }
   0x7   : > { %p200_p3 = scmp.ne.s32.totalorder %s3314_s25, %s3310_s24  ;;  %p201_p4 = scmp.eq.s32.totalorder %s2531_s29, 1 }
   0x8   : > { %s3411_s10 = scalar_select %p182_p1, %s3318_s26, %s184_s8  }
   0x9   : > { %p3413_p5 = por %p195_p2, %p194_p0  ;;  %p3417_p6 = por %p201_p4, %p200_p3 }
   0xa   : > { %p2534_p7 = scmp.ge.s32.totalorder %s3322_s27, 1  ;;  %p252_p8 = scmp.lt.s32.totalorder %s3322_s27, 3 }
   0xc   : > { %p253_p9 = pnand %p2534_p7, %p252_p8 }
   0xe   : > { %256 = sbr.rel (%p253_p9) target bundleno = 1289 (0x509), region = 48 }
  0x15   : > { %v3252_v0 = vld [vmem:[%s4186_s5] sm:$0xff]   ;;  %s2535_s15 = sshll.u32 %s3396_s28, 3  ;;  %vm317_vm0 = vcmask 130048   ;;  %s3324_s8 = smov 16   ;;  %vm1307_vm1 = vcmask 261248   ;;  %vm1318_vm2 = vcmask 392448  }
  0x16   : > { %p289_p10 = scmp.lt.s32.totalorder %s2535_s15, 15  ;;  %2741 = vmatprep.subr.bf16.mxu0 %v3252_v0  ;;  %v3430_v1 = vld [vmem:[%s4185_s4] sm:$0xff]   ;;  %3095 = vmatprep.subr.bf16.mxu1 %v3252_v0  ;;  %s3325_s9 = smov 48   ;;  %vm1329_vm3 = vcmask 523648   ;;  %vm1340_vm4 = vcmask 654848   ;;  %vm1351_vm5 = vcmask 786048  }
  0x17   : > { %2742 = vmatpush3.bf16.msra.mxu0 %v3252_v0  ;;  %3096 = vmatpush3.bf16.msra.mxu1 %v3252_v0  ;;  %s3326_s13 = smov 32   ;;  %s3327_s14 = smov 80   ;;  %vm1362_vm6 = vcmask 917248   ;;  %vm1373_vm7 = vcmask 1048448   ;;  %vm3333_vm8 = vmmov 0   ;;  %vm1852_vm9 = vcmask 523264  }
  0x18   : > { %s4222_s15 = smov (!%p289_p10, %s2535_s15), 15  ;;  %2783 = vmatprep.subr.bf16.mxu0 %v3430_v1  ;;  %s3329_s16 = smov 112   ;;  %vm2439_vm10 = vcmask 31744   ;;  %vm2449_vm11 = vcmask 24576  }
  0x19   : > { %s2536_s18 = sshll.u32 %s4222_s15, 3  ;;  %s3328_s15 = smov 64  }
  0x1a   : > { %s292_s21 = scalar_lea.vmem %s4181_s0, %s2536_s18  ;;  %s3439_s29 = scalar_lea.vmem %s4182_s1, %s2536_s18 }
  0x1b   : > { %v301_v2 = vld [vmem:[%s292_s21] sm:$0xff]  ;;  %v302_v3 = vld [vmem:[%s292_s21 + $0x8] sm:$0xff]  ;;  %v303_v4 = vld [vmem:[%s292_s21 + $0x10] sm:$0xff]  ;;  %s3330_s17 = smov 96  }
  0x1c   : > { %318 = vst.msk [vmem:[#allocation2] sm:$0xff] %vm317_vm0, %v301_v2  ;;  %319 = vst.msk [vmem:[#allocation2 + $0x8] sm:$0xff] %vm317_vm0, %v302_v3  ;;  %v304_v5 = vld [vmem:[%s292_s21 + $0x18] sm:$0xff]  ;;  %v305_v6 = vld [vmem:[%s292_s21 + $0x20] sm:$0xff]  ;;  %v334_v8 = vmul.f32 %v301_v2, %v301_v2  ;;  %v335_v9 = vmul.f32 %v302_v3, %v302_v3  ;;  %v336_v10 = vmul.f32 %v303_v4, %v303_v4 }
  0x1d   : > { %320 = vst.msk [vmem:[#allocation2 + $0x10] sm:$0xff] %vm317_vm0, %v303_v4  ;;  %v306_v7 = vld [vmem:[%s292_s21 + $0x28] sm:$0xff]  ;;  %321 = vst.msk [vmem:[#allocation2 + $0x18] sm:$0xff] %vm317_vm0, %v304_v5  ;;  %v307_v11 = vld [vmem:[%s292_s21 + $0x30] sm:$0xff]  ;;  %v337_v14 = vmul.f32 %v304_v5, %v304_v5  ;;  %v338_v15 = vmul.f32 %v305_v6, %v305_v6 }
  0x1e   : > { %322 = vst.msk [vmem:[#allocation2 + $0x20] sm:$0xff] %vm317_vm0, %v305_v6  ;;  %323 = vst.msk [vmem:[#allocation2 + $0x28] sm:$0xff] %vm317_vm0, %v306_v7  ;;  %v308_v12 = vld [vmem:[%s292_s21 + $0x38] sm:$0xff]  ;;  %v309_v13 = vld [vmem:[%s3439_s29] sm:$0xff]  ;;  %v339_v16 = vmul.f32 %v306_v7, %v306_v7  ;;  %v340_v20 = vmul.f32 %v307_v11, %v307_v11 }
  0x1f   : > { %324 = vst.msk [vmem:[#allocation2 + $0x30] sm:$0xff] %vm317_vm0, %v307_v11  ;;  %325 = vst.msk [vmem:[#allocation2 + $0x38] sm:$0xff] %vm317_vm0, %v308_v12  ;;  %v310_v17 = vld [vmem:[%s3439_s29 + $0x8] sm:$0xff]  ;;  %v311_v18 = vld [vmem:[%s3439_s29 + $0x10] sm:$0xff]  ;;  %v341_v21 = vmul.f32 %v308_v12, %v308_v12  ;;  %v350_v22 = vmul.f32 %v309_v13, %v309_v13  ;;  %v366_v23 = vmul.f32 %v309_v13, %v301_v2 }
  0x20   : > { %326 = vst.msk [vmem:[#allocation2 + $0x40] sm:$0xff] %vm317_vm0, %v309_v13  ;;  %v312_v19 = vld [vmem:[%s3439_s29 + $0x18] sm:$0xff]  ;;  %342 = vst.msk [vmem:[#allocation2 + $0x80] sm:$0xff] %vm317_vm0, %v334_v8  ;;  %v313_v24 = vld [vmem:[%s3439_s29 + $0x20] sm:$0xff]  ;;  %v351_v27 = vmul.f32 %v310_v17, %v310_v17  ;;  %v352_v28 = vmul.f32 %v311_v18, %v311_v18  ;;  %v367_v30 = vmul.f32 %v310_v17, %v302_v3 }
  0x21   : > { %343 = vst.msk [vmem:[#allocation2 + $0x88] sm:$0xff] %vm317_vm0, %v335_v9  ;;  %344 = vst.msk [vmem:[#allocation2 + $0x90] sm:$0xff] %vm317_vm0, %v336_v10  ;;  %v314_v25 = vld [vmem:[%s3439_s29 + $0x28] sm:$0xff]  ;;  %v315_v26 = vld [vmem:[%s3439_s29 + $0x30] sm:$0xff]  ;;  %v353_v29 = vmul.f32 %v312_v19, %v312_v19  ;;  %v354_v32 = vmul.f32 %v313_v24, %v313_v24  ;;  %v368_v35 = vmul.f32 %v311_v18, %v303_v4 }
  0x22   : > { %327 = vst.msk [vmem:[#allocation2 + $0x48] sm:$0xff] %vm317_vm0, %v310_v17  ;;  %328 = vst.msk [vmem:[#allocation2 + $0x50] sm:$0xff] %vm317_vm0, %v311_v18  ;;  %v316_v31 = vld [vmem:[%s3439_s29 + $0x38] sm:$0xff]  ;;  %v355_v33 = vmul.f32 %v314_v25, %v314_v25  ;;  %v356_v34 = vmul.f32 %v315_v26, %v315_v26  ;;  %v369_v37 = vmul.f32 %v312_v19, %v304_v5  ;;  %s286_s29 = sand.u32 1, %s3314_s25  }
  0x23   : > { %329 = vst.msk [vmem:[#allocation2 + $0x58] sm:$0xff] %vm317_vm0, %v312_v19  ;;  %345 = vst.msk [vmem:[#allocation2 + $0x98] sm:$0xff] %vm317_vm0, %v337_v14  ;;  %v357_v36 = vmul.f32 %v316_v31, %v316_v31  ;;  %v370_v38 = vmul.f32 %v313_v24, %v305_v6  ;;  %v371_v39 = vmul.f32 %v314_v25, %v306_v7  ;;  %v382_v42 = vld [vmem:[#allocation2] sm:$0xff]  ;;  %v383_v43 = vld [vmem:[#allocation2 + $0x8] sm:$0xff] }
  0x24   : > { %346 = vst.msk [vmem:[#allocation2 + $0xa0] sm:$0xff] %vm317_vm0, %v338_v15  ;;  %347 = vst.msk [vmem:[#allocation2 + $0xa8] sm:$0xff] %vm317_vm0, %v339_v16  ;;  %v372_v40 = vmul.f32 %v315_v26, %v307_v11  ;;  %v373_v41 = vmul.f32 %v316_v31, %v308_v12  ;;  %v384_v44 = vld [vmem:[#allocation2 + $0x10] sm:$0xff]  ;;  %v3487_v45 = vpack.c.bf16 %v383_v43, %v382_v42  ;;  %v385_v46 = vld [vmem:[#allocation2 + $0x18] sm:$0xff] }
  0x25   : > { %330 = vst.msk [vmem:[#allocation2 + $0x60] sm:$0xff] %vm317_vm0, %v313_v24  ;;  %331 = vst.msk [vmem:[#allocation2 + $0x68] sm:$0xff] %vm317_vm0, %v314_v25  ;;  %v386_v47 = vld [vmem:[#allocation2 + $0x20] sm:$0xff]  ;;  %v387_v48 = vld [vmem:[#allocation2 + $0x28] sm:$0xff]  ;;  %v3491_v49 = vpack.c.bf16 %v385_v46, %v384_v44 }
  0x26   : > { %332 = vst.msk [vmem:[#allocation2 + $0x70] sm:$0xff] %vm317_vm0, %v315_v26  ;;  %348 = vst.msk [vmem:[#allocation2 + $0xb0] sm:$0xff] %vm317_vm0, %v340_v20  ;;  %v3493_v50 = vpack.c.bf16 %v387_v48, %v386_v47  ;;  %v388_v51 = vld [vmem:[#allocation2 + $0x30] sm:$0xff]  ;;  %v389_v52 = vld [vmem:[#allocation2 + $0x38] sm:$0xff]  ;;  %2743 = vmatprep.mubr.msk.bf16.mxu0 %vm317_vm0, %v3487_v45  ;;  %v446_v55 = vunpack.c.l.bf16 %v3487_v45  ;;  %v447_v56 = vunpack.c.h.bf16 %v3487_v45 }
  0x27   : > { %349 = vst.msk [vmem:[#allocation2 + $0xb8] sm:$0xff] %vm317_vm0, %v341_v21  ;;  %358 = vst.msk [vmem:[#allocation2 + $0xc0] sm:$0xff] %vm317_vm0, %v350_v22  ;;  %v390_v53 = vld [vmem:[#allocation2 + $0x40] sm:$0xff]  ;;  %v448_v57 = vunpack.c.l.bf16 %v3491_v49  ;;  %v449_v58 = vunpack.c.h.bf16 %v3491_v49  ;;  %2744 = vmatmul.mubr.msk.bf16.vlgmr.msra.gmra.mrb[0].mxu0 %vm317_vm0, %v3491_v49  ;;  %v3505_v59 = vpack.c.bf16 %v389_v52, %v388_v51 }
  0x28   : > { %374 = vst.msk [vmem:[#allocation2 + $0x100] sm:$0xff] %vm317_vm0, %v366_v23  ;;  %333 = vst.msk [vmem:[#allocation2 + $0x78] sm:$0xff] %vm317_vm0, %v316_v31  ;;  %2747 = vmatprep.mubr.msk.bf16.mxu0 %vm317_vm0, %v3493_v50  ;;  %2784 = vmatpush3.bf16.msra.mxu0 %v3430_v1  ;;  %v3508_v60 = vld [vmem:[#allocation2 + $0x80] sm:$0xff]  ;;  %v3510_v61 = vld [vmem:[#allocation2 + $0x88] sm:$0xff]  ;;  %v3512_v62 = vsub.f32 %v382_v42, %v446_v55  ;;  %v3514_v63 = vsub.f32 %v383_v43, %v447_v56  ;;  %v450_v0 = vunpack.c.l.bf16 %v3493_v50 }
  0x29   : > { %359 = vst.msk [vmem:[#allocation2 + $0xc8] sm:$0xff] %vm317_vm0, %v351_v27  ;;  %360 = vst.msk [vmem:[#allocation2 + $0xd0] sm:$0xff] %vm317_vm0, %v352_v28  ;;  %v391_v54 = vld [vmem:[#allocation2 + $0x48] sm:$0xff]  ;;  %v3517_v2 = vsub.f32 %v384_v44, %v448_v57  ;;  %v3519_v3 = vsub.f32 %v385_v46, %v449_v58  ;;  %v3525_v5 = vpack.c.bf16 %v3510_v61, %v3508_v60  ;;  %v3527_v6 = vld [vmem:[#allocation2 + $0x90] sm:$0xff]  ;;  %2825 = vmatprep.subr.bf16.mxu0 %v3430_v1 }
  0x2a   : > { %361 = vst.msk [vmem:[#allocation2 + $0xd8] sm:$0xff] %vm317_vm0, %v353_v29  ;;  %375 = vst.msk [vmem:[#allocation2 + $0x108] sm:$0xff] %vm317_vm0, %v367_v30  ;;  %v3521_v4 = vpack.c.bf16 %v391_v54, %v390_v53  ;;  %v3529_v7 = vld [vmem:[#allocation2 + $0x98] sm:$0xff]  ;;  %v392_v9 = vld [vmem:[#allocation2 + $0x50] sm:$0xff]  ;;  %v451_v14 = vunpack.c.h.bf16 %v3493_v50  ;;  %v3543_v15 = vsub.f32 %v386_v47, %v450_v0  ;;  %v452_v20 = vunpack.c.l.bf16 %v3505_v59 }
  0x2b   : > { %362 = vst.msk [vmem:[#allocation2 + $0xe0] sm:$0xff] %vm317_vm0, %v354_v32  ;;  %363 = vst.msk [vmem:[#allocation2 + $0xe8] sm:$0xff] %vm317_vm0, %v355_v33  ;;  %v3532_v8 = vld [vmem:[#allocation2 + $0xa0] sm:$0xff]  ;;  %v393_v10 = vld [vmem:[#allocation2 + $0x58] sm:$0xff]  ;;  %v3536_v11 = vpack.c.bf16 %v3529_v7, %v3527_v6  ;;  %2759 = vmatprep.mubr.msk.bf16.mxu1 %vm317_vm0, %v3525_v5  ;;  %v453_v24 = vunpack.c.h.bf16 %v3505_v59  ;;  %v462_v56 = vunpack.c.l.bf16 %v3525_v5  ;;  %v463_v57 = vunpack.c.h.bf16 %v3525_v5 }
  0x2c   : > { %364 = vst.msk [vmem:[#allocation2 + $0xf0] sm:$0xff] %vm317_vm0, %v356_v34  ;;  %376 = vst.msk [vmem:[#allocation2 + $0x110] sm:$0xff] %vm317_vm0, %v368_v35  ;;  %v3538_v12 = vld [vmem:[#allocation2 + $0xa8] sm:$0xff]  ;;  %v394_v17 = vld [vmem:[#allocation2 + $0x60] sm:$0xff]  ;;  %v3554_v23 = vsub.f32 %v387_v48, %v451_v14  ;;  %v454_v25 = vunpack.c.l.bf16 %v3521_v4  ;;  %v3560_v26 = vpack.c.bf16 %v393_v10, %v392_v9  ;;  %v3562_v29 = vsub.f32 %v388_v51, %v452_v20 }
  0x2d   : > { %365 = vst.msk [vmem:[#allocation2 + $0xf8] sm:$0xff] %vm317_vm0, %v357_v36  ;;  %377 = vst.msk [vmem:[#allocation2 + $0x118] sm:$0xff] %vm317_vm0, %v369_v37  ;;  %v395_v18 = vld [vmem:[#allocation2 + $0x68] sm:$0xff]  ;;  %v3549_v19 = vpack.c.bf16 %v3538_v12, %v3532_v8  ;;  %v396_v21 = vld [vmem:[#allocation2 + $0x70] sm:$0xff]  ;;  %2760 = vmatmul.mubr.msk.bf16.vlgmr.msra.gmra.mrb[0].mxu1 %vm317_vm0, %v3536_v11  ;;  %v455_v30 = vunpack.c.h.bf16 %v3521_v4  ;;  %v3575_v35 = vsub.f32 %v389_v52, %v453_v24  ;;  %v464_v58 = vunpack.c.l.bf16 %v3536_v11 }
  0x2e   : > { %378 = vst.msk [vmem:[#allocation2 + $0x120] sm:$0xff] %vm317_vm0, %v370_v38  ;;  %379 = vst.msk [vmem:[#allocation2 + $0x128] sm:$0xff] %vm317_vm0, %v371_v39  ;;  %v404_v27 = vld [vmem:[#allocation2 + $0xb0] sm:$0xff]  ;;  %v405_v28 = vld [vmem:[#allocation2 + $0xb8] sm:$0xff]  ;;  %v3567_v31 = vpack.c.bf16 %v395_v18, %v394_v17  ;;  %v3577_v36 = vsub.f32 %v390_v53, %v454_v25  ;;  %v456_v39 = vunpack.c.l.bf16 %v3560_v26  ;;  %v457_v42 = vunpack.c.h.bf16 %v3560_v26 }
  0x2f   : > { %380 = vst.msk [vmem:[#allocation2 + $0x130] sm:$0xff] %vm317_vm0, %v372_v40  ;;  %381 = vst.msk [vmem:[#allocation2 + $0x138] sm:$0xff] %vm317_vm0, %v373_v41  ;;  %v397_v22 = vld [vmem:[#allocation2 + $0x78] sm:$0xff]  ;;  %2763 = vmatprep.mubr.msk.bf16.mxu1 %vm317_vm0, %v3549_v19  ;;  %v3569_v32 = vld [vmem:[#allocation2 + $0xc0] sm:$0xff]  ;;  %2748 = vmatmul.mubr.msk.bf16.gmra.mrb[4].mxu0 %vm317_vm0, %v3505_v59  ;;  %v3583_v38 = vsub.f32 %v391_v54, %v455_v30  ;;  %v3588_v40 = vpack.c.bf16 %v405_v28, %v404_v27  ;;  %v465_v14 = vunpack.c.h.bf16 %v3536_v11 }
  0x30   : > { %v3571_v33 = vld [vmem:[#allocation2 + $0xc8] sm:$0xff]  ;;  %v3581_v37 = vpack.c.bf16 %v397_v22, %v396_v21  ;;  %2751 = vmatprep.mubr.msk.bf16.mxu0 %vm317_vm0, %v3521_v4  ;;  %v458_v43 = vunpack.c.l.bf16 %v3567_v31  ;;  %v3600_v47 = vsub.f32 %v392_v9, %v456_v39  ;;  %v459_v48 = vunpack.c.h.bf16 %v3567_v31 }
  0x31   : > { %v3596_v44 = vpack.c.bf16 %v3571_v33, %v3569_v32  ;;  %v3603_v51 = vsub.f32 %v393_v10, %v457_v42  ;;  %v3629_v20 = vsub.f32 %v3510_v61, %v463_v57  ;;  %v3632_v24 = vsub.f32 %v3527_v6, %v464_v58  ;;  %v409_v25 = vld [vmem:[#allocation2 + $0xd8] sm:$0xff] }
  0x32   : > { %v3605_v52 = vsub.f32 %v394_v17, %v458_v43  ;;  %v460_v53 = vunpack.c.l.bf16 %v3581_v37  ;;  %v461_v54 = vunpack.c.h.bf16 %v3581_v37  ;;  %v3609_v55 = vsub.f32 %v395_v18, %v459_v48  ;;  %v410_v39 = vld [vmem:[#allocation2 + $0xe0] sm:$0xff]  ;;  %v411_v42 = vld [vmem:[#allocation2 + $0xe8] sm:$0xff] }
  0x33   : > { %v3626_v18 = vsub.f32 %v3508_v60, %v462_v56  ;;  %v408_v60 = vld [vmem:[#allocation2 + $0xd0] sm:$0xff]  ;;  %v466_v6 = vunpack.c.l.bf16 %v3549_v19  ;;  %v467_v30 = vunpack.c.h.bf16 %v3549_v19  ;;  %v468_v43 = vunpack.c.l.bf16 %v3588_v40 }
  0x34   : > { %v3616_v9 = vsub.f32 %v396_v21, %v460_v53  ;;  %v3618_v10 = vsub.f32 %v397_v22, %v461_v54  ;;  %v3639_v22 = vsub.f32 %v3529_v7, %v465_v14  ;;  %v469_v48 = vunpack.c.h.bf16 %v3588_v40 }
  0x35   : > { %2764 = vmatmul.mubr.msk.bf16.gmra.mrb[4].mxu1 %vm317_vm0, %v3588_v40  ;;  %v3654_v53 = vsub.f32 %v3532_v8, %v466_v6  ;;  %v3657_v54 = vsub.f32 %v3538_v12, %v467_v30  ;;  %v3659_v56 = vpack.c.bf16 %v409_v25, %v408_v60  ;;  %v3661_v57 = vsub.f32 %v404_v27, %v468_v43  ;;  %v412_v8 = vld [vmem:[#allocation2 + $0xf0] sm:$0xff]  ;;  %v413_v12 = vld [vmem:[#allocation2 + $0xf8] sm:$0xff]  ;;  %v414_v6 = vld [vmem:[#allocation2 + $0x100] sm:$0xff] }
  0x36   : > { %2767 = vmatprep.mubr.msk.bf16.mxu1 %vm317_vm0, %v3596_v44  ;;  %v3663_v58 = vsub.f32 %v405_v28, %v469_v48  ;;  %v3665_v14 = vpack.c.bf16 %v411_v42, %v410_v39  ;;  %v470_v27 = vunpack.c.l.bf16 %v3596_v44  ;;  %v471_v28 = vunpack.c.h.bf16 %v3596_v44  ;;  %v415_v30 = vld [vmem:[#allocation2 + $0x108] sm:$0xff] }
  0x37   : > { %2752 = vmatmul.mubr.msk.bf16.gmra.mrb[8].mxu0 %vm317_vm0, %v3560_v26  ;;  %v472_v43 = vunpack.c.l.bf16 %v3659_v56  ;;  %v473_v48 = vunpack.c.h.bf16 %v3659_v56  ;;  %v3689_v21 = vpack.c.bf16 %v413_v12, %v412_v8  ;;  %v3695_v46 = vpack.c.bf16 %v415_v30, %v414_v6 }
  0x38   : > { %2755 = vmatprep.mubr.msk.bf16.mxu0 %vm317_vm0, %v3567_v31  ;;  %v3684_v61 = vsub.f32 %v3569_v32, %v470_v27  ;;  %v3687_v7 = vsub.f32 %v3571_v33, %v471_v28  ;;  %v416_v32 = vld [vmem:[#allocation2 + $0x110] sm:$0xff]  ;;  %v417_v33 = vld [vmem:[#allocation2 + $0x118] sm:$0xff]  ;;  %v418_v27 = vld [vmem:[#allocation2 + $0x120] sm:$0xff] }
  0x39   : > { %v3691_v17 = vsub.f32 %v408_v60, %v472_v43  ;;  %v3693_v0 = vsub.f32 %v409_v25, %v473_v48  ;;  %v474_v60 = vunpack.c.l.bf16 %v3665_v14  ;;  %v475_v25 = vunpack.c.h.bf16 %v3665_v14  ;;  %v419_v28 = vld [vmem:[#allocation2 + $0x128] sm:$0xff] }
  0x3a   : > { %4195 = vst [vmem:[#allocation7_spill] sm:$0xff] %v3684_v61  ;;  %4196 = vst [vmem:[#allocation8_spill] sm:$0xff] %v3687_v7  ;;  %v476_v43 = vunpack.c.l.bf16 %v3689_v21  ;;  %v477_v48 = vunpack.c.h.bf16 %v3689_v21  ;;  %v444_v13 = vpack.c.bf16 %v419_v28, %v418_v27 }
  0x3b   : > { %4197 = vst [vmem:[#allocation9_spill] sm:$0xff] %v3691_v17  ;;  %4198 = vst [vmem:[#allocation10_spill] sm:$0xff] %v3693_v0  ;;  %v3714_v41 = vsub.f32 %v410_v39, %v474_v60  ;;  %v420_v39 = vld [vmem:[#allocation2 + $0x130] sm:$0xff] }
  0x3c   : > { %v3718_v34 = vsub.f32 %v412_v8, %v476_v43  ;;  %v3720_v16 = vsub.f32 %v413_v12, %v477_v48  ;;  %v478_v8 = vunpack.c.l.bf16 %v3695_v46  ;;  %v479_v12 = vunpack.c.h.bf16 %v3695_v46 }
  0x3d   : > { %2768 = vmatmul.mubr.msk.bf16.gmra.mrb[8].mxu1 %vm317_vm0, %v3659_v56  ;;  %v483_v0 = vunpack.c.h.bf16 %v444_v13 }
  0x3e   : > { %2771 = vmatprep.mubr.msk.bf16.mxu1 %vm317_vm0, %v3665_v14 }
  0x3f   : > { %2756 = vmatmul.mubr.msk.bf16.gmra.mrb[12].mxu0 %vm317_vm0, %v3581_v37 }
  0x40   : > { %2785 = vmatprep.mubr.msk.bf16.mxu0 %vm317_vm0, %v3487_v45  ;;  %v443_v45 = vpack.c.bf16 %v417_v33, %v416_v32 }
  0x42   : > { %v481_v60 = vunpack.c.h.bf16 %v443_v45 }
  0x44   : > { %v521_v48 = vsub.f32 %v417_v33, %v481_v60 }
  0x45   : > { %2772 = vmatmul.mubr.msk.bf16.gmra.mrb[12].mxu1 %vm317_vm0, %v3689_v21 }
  0x46   : > { %2775 = vmatprep.mubr.msk.bf16.mxu1 %vm317_vm0, %v3695_v46 }
  0x47   : > { %2786 = vmatmul.mubr.msk.bf16.vlgmr.msra.gmra.mrb[0].mxu0 %vm317_vm0, %v3491_v49  ;;  %v3716_v49 = vsub.f32 %v411_v42, %v475_v25  ;;  %v421_v42 = vld [vmem:[#allocation2 + $0x138] sm:$0xff]  ;;  %v518_v25 = vsub.f32 %v414_v6, %v478_v8  ;;  %v523_v6 = vsub.f32 %v419_v28, %v483_v0 }
  0x48   : > { %2789 = vmatprep.mubr.msk.bf16.mxu0 %vm317_vm0, %v3493_v50  ;;  %2826 = vmatpush3.bf16.msra.mxu0 %v3430_v1  ;;  %v541_v1 = vpack.c.bf16 %v3720_v16, %v3718_v34  ;;  %v519_v16 = vsub.f32 %v415_v30, %v479_v12  ;;  %v445_v34 = vpack.c.bf16 %v421_v42, %v420_v39 }
  0x49   : > { %v540_v50 = vpack.c.bf16 %v3716_v49, %v3714_v41  ;;  %v480_v41 = vunpack.c.l.bf16 %v443_v45 }
  0x4a   : > { %v542_v49 = vpack.c.bf16 %v519_v16, %v518_v25  ;;  %v485_v61 = vunpack.c.h.bf16 %v445_v34 }
  0x4b   : > { %v520_v43 = vsub.f32 %v416_v32, %v480_v41 }
  0x4c   : > { %v525_v8 = vsub.f32 %v421_v42, %v485_v61 }
  0x4d   : > { %2776 = vmatmul.mubr.msk.bf16.gmra.mrb[16].mxu1 %vm317_vm0, %v443_v45  ;;  %v543_v17 = vpack.c.bf16 %v521_v48, %v520_v43 }
  0x4e   : > { %2779 = vmatprep.mubr.msk.bf16.mxu1 %vm317_vm0, %v444_v13 }
  0x4f   : > { %2790 = vmatmul.mubr.msk.bf16.gmra.mrb[4].mxu0 %vm317_vm0, %v3505_v59  ;;  %v482_v59 = vunpack.c.l.bf16 %v444_v13 }
  0x50   : > { %2793 = vmatprep.mubr.msk.bf16.mxu0 %vm317_vm0, %v3521_v4  ;;  %v484_v4 = vunpack.c.l.bf16 %v445_v34 }
  0x51   : > { %v522_v7 = vsub.f32 %v418_v27, %v482_v59 }
  0x52   : > { %v524_v30 = vsub.f32 %v420_v39, %v484_v4 }
  0x53   : > { %v544_v32 = vpack.c.bf16 %v523_v6, %v522_v7 }
  0x54   : > { %v545_v33 = vpack.c.bf16 %v525_v8, %v524_v30 }
  0x55   : > { %2780 = vmatmul.mubr.msk.bf16.gmra.mrb[20].mxu1 %vm317_vm0, %v445_v34 }
  0x57   : > { %2794 = vmatmul.mubr.msk.bf16.gmra.mrb[8].mxu0 %vm317_vm0, %v3560_v26  ;;  %v4209_v26 = vpack.c.bf16 %v3657_v54, %v3654_v53 }
  0x58   : > { %2797 = vmatprep.mubr.msk.bf16.mxu0 %vm317_vm0, %v3567_v31  ;;  %v4211_v31 = vld [vmem:[#allocation8_spill] sm:$0xff] }
  0x5f   : > { %2798 = vmatmul.mubr.msk.bf16.gmra.mrb[12].mxu0 %vm317_vm0, %v3581_v37  ;;  %v4214_v37 = vld [vmem:[#allocation10_spill] sm:$0xff] }
  0x60   : > { %2801 = vmatprep.mubr.msk.bf16.mxu0 %vm317_vm0, %v3525_v5  ;;  %v4199_v5 = vpack.c.bf16 %v3514_v63, %v3512_v62  ;;  %v4203_v62 = vpack.c.bf16 %v3583_v38, %v3577_v36  ;;  %v4204_v63 = vpack.c.bf16 %v3603_v51, %v3600_v47  ;;  %v4215_v38 = vld [vmem:[#allocation9_spill] sm:$0xff] }
  0x67   : > { %2802 = vmatmul.mubr.msk.bf16.gmra.mrb[16].mxu0 %vm317_vm0, %v3536_v11  ;;  %v4200_v11 = vpack.c.bf16 %v3519_v3, %v3517_v2  ;;  %v4205_v2 = vpack.c.bf16 %v3609_v55, %v3605_v52  ;;  %v4206_v3 = vpack.c.bf16 %v3618_v10, %v3616_v9 }
  0x68   : > { %2805 = vmatprep.mubr.msk.bf16.mxu0 %vm317_vm0, %v3549_v19  ;;  %v4201_v19 = vpack.c.bf16 %v3554_v23, %v3543_v15  ;;  %v4207_v15 = vpack.c.bf16 %v3629_v20, %v3626_v18  ;;  %v4208_v23 = vpack.c.bf16 %v3639_v22, %v3632_v24 }
  0x6f   : > { %2806 = vmatmul.mubr.msk.bf16.gmra.mrb[20].mxu0 %vm317_vm0, %v3588_v40  ;;  %v4216_v40 = vpack.c.bf16 %v4214_v37, %v4215_v38 }
  0x70   : > { %2809 = vmatprep.mubr.msk.bf16.mxu0 %vm317_vm0, %v3596_v44 }
  0x77   : > { %2810 = vmatmul.mubr.msk.bf16.gmra.mrb[24].mxu0 %vm317_vm0, %v3659_v56 }
  0x78   : > { %2813 = vmatprep.mubr.msk.bf16.mxu0 %vm317_vm0, %v3665_v14 }
  0x7f   : > { %2814 = vmatmul.mubr.msk.bf16.gmra.mrb[28].mxu0 %vm317_vm0, %v3689_v21 }
  0x80   : > { %2817 = vmatprep.mubr.msk.bf16.mxu0 %vm317_vm0, %v3695_v46 }
  0x87   : > { %2818 = vmatmul.mubr.msk.bf16.gmra.mrb[32].mxu0 %vm317_vm0, %v443_v45 }
  0x88   : > { %2821 = vmatprep.mubr.msk.bf16.mxu0 %vm317_vm0, %v444_v13  ;;  %v4202_v13 = vpack.c.bf16 %v3575_v35, %v3562_v29  ;;  %v4210_v29 = vpack.c.bf16 %v3663_v58, %v3661_v57  ;;  %v4212_v35 = vld [vmem:[#allocation7_spill] sm:$0xff] }
  0x89   : > { %v4213_v36 = vpack.c.bf16 %v4211_v31, %v4212_v35 }
  0x8f   : > { %2822 = vmatmul.mubr.msk.bf16.gmra.mrb[36].mxu0 %vm317_vm0, %v445_v34 }
  0x90   : > { %2827 = vmatprep.mubr.msk.bf16.mxu0 %vm317_vm0, %v4199_v5 }
  0x97   : > { %2828 = vmatmul.mubr.msk.bf16.vlgmr.msra.gmra.mrb[0].mxu0 %vm317_vm0, %v4200_v11 }
  0x98   : > { %2831 = vmatprep.mubr.msk.bf16.mxu0 %vm317_vm0, %v4201_v19 }
  0x9f   : > { %2832 = vmatmul.mubr.msk.bf16.gmra.mrb[4].mxu0 %vm317_vm0, %v4202_v13 }
  0xa0   : > { %2835 = vmatprep.mubr.msk.bf16.mxu0 %vm317_vm0, %v4203_v62 }
  0xa7   : > { %2836 = vmatmul.mubr.msk.bf16.gmra.mrb[8].mxu0 %vm317_vm0, %v4204_v63 }
  0xa8   : > { %2839 = vmatprep.mubr.msk.bf16.mxu0 %vm317_vm0, %v4205_v2 }
  0xaf   : > { %2840 = vmatmul.mubr.msk.bf16.gmra.mrb[12].mxu0 %vm317_vm0, %v4206_v3 }
  0xb0   : > { %2843 = vmatprep.mubr.msk.bf16.mxu0 %vm317_vm0, %v4207_v15 }
  0xb7   : > { %2844 = vmatmul.mubr.msk.bf16.gmra.mrb[16].mxu0 %vm317_vm0, %v4208_v23 }
  0xb8   : > { %2847 = vmatprep.mubr.msk.bf16.mxu0 %vm317_vm0, %v4209_v26 }
  0xbf   : > { %2848 = vmatmul.mubr.msk.bf16.gmra.mrb[20].mxu0 %vm317_vm0, %v4210_v29 }
  0xc0   : > { %2851 = vmatprep.mubr.msk.bf16.mxu0 %vm317_vm0, %v4213_v36 }
  0xc7   : > { %2852 = vmatmul.mubr.msk.bf16.gmra.mrb[24].mxu0 %vm317_vm0, %v4216_v40 }
  0xc8   : > { %2855 = vmatprep.mubr.msk.bf16.mxu0 %vm317_vm0, %v540_v50 }
  0xcf   : > { %2856 = vmatmul.mubr.msk.bf16.gmra.mrb[28].mxu0 %vm317_vm0, %v541_v1 }
  0xd0   : > { %2859 = vmatprep.mubr.msk.bf16.mxu0 %vm317_vm0, %v542_v49 }
  0xd7   : > { %2860 = vmatmul.mubr.msk.bf16.gmra.mrb[32].mxu0 %vm317_vm0, %v543_v17 }
  0xd8   : > { %2863 = vmatprep.mubr.msk.bf16.mxu0 %vm317_vm0, %v544_v32 }
  0xdf   : > { %2864 = vmatmul.mubr.msk.bf16.gmra.mrb[36].mxu0 %vm317_vm0, %v545_v33 }
 0x100   : > { %v3824_v44 = vpop.f32.mrb[0].mxu1 }
 0x101   : > { %v3826_v46 = vpop.f32.mrb[1].mxu1 }
 0x102   : > { %v3828_v47 = vpop.f32.mrb[2].mxu1 }
 0x103   : > { %v3830_v51 = vpop.f32.mrb[3].mxu1 }
 0x108   : > { %v3832_v52 = vpop.f32.mrb[4].mxu1 }
 0x109   : > { %v3834_v55 = vpop.f32.mrb[5].mxu1 }
 0x10a   : > { %v3836_v0 = vpop.f32.mrb[6].mxu1 }
 0x10b   : > { %v3838_v9 = vpop.f32.mrb[7].mxu1 }
 0x110   : > { %v3840_v10 = vpop.f32.mrb[8].mxu1 }
 0x111   : > { %v3842_v17 = vpop.f32.mrb[9].mxu1 }
 0x112   : > { %v3844_v18 = vpop.f32.mrb[10].mxu1 }
 0x113   : > { %v3846_v20 = vpop.f32.mrb[11].mxu1 }
 0x118   : > { %v3848_v24 = vpop.f32.mrb[12].mxu1 }
 0x119   : > { %v3850_v21 = vpop.f32.mrb[13].mxu1 }
 0x11a   : > { %v3852_v22 = vpop.f32.mrb[14].mxu1 }
 0x11b   : > { %v3854_v61 = vpop.f32.mrb[15].mxu1 }
 0x120   : > { %v3856_v7 = vpop.f32.mrb[16].mxu1 }
 0x121   : > { %v3858_v53 = vpop.f32.mrb[17].mxu1 }
 0x122   : > { %v3860_v54 = vpop.f32.mrb[18].mxu1 }
 0x123   : > { %v3862_v56 = vpop.f32.mrb[19].mxu1 }
 0x128   : > { %v3864_v57 = vpop.f32.mrb[20].mxu1 }
 0x129   : > { %v3866_v58 = vpop.f32.mrb[21].mxu1 }
 0x12a   : > { %v3868_v14 = vpop.f32.mrb[22].mxu1 }
 0x12b   : > { %v3870_v45 = vpop.f32.mrb[23].mxu1 }
 0x16a   : > { %v2829_v27 = vpop.f32.mrb[0].mxu0 }
 0x16b   : > { %1301 = vrot.lane.b32.xlu1 %v2829_v27, %s3324_s8  ;;  %v1098_v28 = vpop.f32.mrb[1].mxu0 }
 0x16c   : > { %1297 = vst.msk [vmem:[#allocation3] sm:$0xff] %vm317_vm0, %v1098_v28  ;;  %v2830_v50 = vpop.f32.mrb[2].mxu0 }
 0x16d   : > { %v1101_v1 = vpop.f32.mrb[3].mxu0 }
 0x16e   : > { %1298 = vst.msk [vmem:[#allocation3 + $0x18] sm:$0xff] %vm317_vm0, %v1101_v1 }
 0x16f   : > { %1303 = vrot.lane.b32.xlu1 %v2830_v50, %s3324_s8 }
 0x172   : > { %v2833_v39 = vpop.f32.mrb[4].mxu0 }
 0x173   : > { %1323 = vrot.lane.b32.xlu0 %v2833_v39, %s3325_s9  ;;  %v1114_v42 = vpop.f32.mrb[5].mxu0 }
 0x174   : > { %v2834_v12 = vpop.f32.mrb[6].mxu0 }
 0x175   : > { %1325 = vrot.lane.b32.xlu1 %v2834_v12, %s3325_s9  ;;  %v1117_v41 = vpop.f32.mrb[7].mxu0 }
 0x177   : > { %1312 = vrot.lane.b32.xlu0 %v1114_v42, %s3326_s13 }
 0x179   : > { %1314 = vrot.lane.b32.xlu1 %v1117_v41, %s3326_s13 }
 0x17a   : > { %v2837_v60 = vpop.f32.mrb[8].mxu0 }
 0x17b   : > { %1345 = vrot.lane.b32.xlu0 %v2837_v60, %s3327_s14  ;;  %v1130_v25 = vpop.f32.mrb[9].mxu0 }
 0x17c   : > { %v2838_v16 = vpop.f32.mrb[10].mxu0 }
 0x17d   : > { %1347 = vrot.lane.b32.xlu1 %v2838_v16, %s3327_s14  ;;  %v1133_v34 = vpop.f32.mrb[11].mxu0 }
 0x17f   : > { %1334 = vrot.lane.b32.xlu0 %v1130_v25, %s3328_s15 }
 0x181   : > { %1336 = vrot.lane.b32.xlu1 %v1133_v34, %s3328_s15 }
 0x182   : > { %v2841_v43 = vpop.f32.mrb[12].mxu0 }
 0x183   : > { %1367 = vrot.lane.b32.xlu0 %v2841_v43, %s3329_s16  ;;  %v1146_v48 = vpop.f32.mrb[13].mxu0 }
 0x184   : > { %v2842_v49 = vpop.f32.mrb[14].mxu0 }
 0x185   : > { %1369 = vrot.lane.b32.xlu1 %v2842_v49, %s3329_s16  ;;  %v1149_v59 = vpop.f32.mrb[15].mxu0 }
 0x187   : > { %1356 = vrot.lane.b32.xlu0 %v1146_v48, %s3330_s17 }
 0x189   : > { %1358 = vrot.lane.b32.xlu1 %v1149_v59, %s3330_s17 }
 0x18a   : > { %v2845_v4 = vpop.f32.mrb[16].mxu0 }
 0x18b   : > { %v3097_v6 = vadd.f32 %v2845_v4, %v3824_v44  ;;  %v1162_v30 = vpop.f32.mrb[17].mxu0 }
 0x18c   : > { %v3098_v8 = vadd.f32 %v1162_v30, %v3826_v46  ;;  %v2846_v32 = vpop.f32.mrb[18].mxu0 }
 0x18d   : > { %v3099_v33 = vadd.f32 %v2846_v32, %v3828_v47  ;;  %1380 = vrot.lane.b32.xlu0 %v3097_v6, %s3324_s8  ;;  %v1165_v5 = vpop.f32.mrb[19].mxu0 }
 0x18e   : > { %1376 = vst.msk [vmem:[#allocation3 + $0x8] sm:$0xff] %vm317_vm0, %v3098_v8  ;;  %v3100_v11 = vadd.f32 %v1165_v5, %v3830_v51 }
 0x190   : > { %1377 = vst.msk [vmem:[#allocation3 + $0x20] sm:$0xff] %vm317_vm0, %v3100_v11 }
 0x191   : > { %1382 = vrot.lane.b32.xlu0 %v3099_v33, %s3324_s8 }
 0x192   : > { %v2849_v19 = vpop.f32.mrb[20].mxu0 }
 0x193   : > { %v3101_v13 = vadd.f32 %v2849_v19, %v3832_v52  ;;  %v1178_v62 = vpop.f32.mrb[21].mxu0 }
 0x194   : > { %v3102_v63 = vadd.f32 %v1178_v62, %v3834_v55  ;;  %v2850_v2 = vpop.f32.mrb[22].mxu0 }
 0x195   : > { %v3103_v3 = vadd.f32 %v2850_v2, %v3836_v0  ;;  %1400 = vrot.lane.b32.xlu0 %v3101_v13, %s3325_s9  ;;  %v1181_v15 = vpop.f32.mrb[23].mxu0 }
 0x196   : > { %v3104_v23 = vadd.f32 %v1181_v15, %v3838_v9 }
 0x197   : > { %1402 = vrot.lane.b32.xlu1 %v3103_v3, %s3325_s9 }
 0x199   : > { %1390 = vrot.lane.b32.xlu0 %v3102_v63, %s3326_s13 }
 0x19a   : > { %v2853_v26 = vpop.f32.mrb[24].mxu0 }
 0x19b   : > { %v3105_v29 = vadd.f32 %v2853_v26, %v3840_v10  ;;  %1392 = vrot.lane.b32.xlu1 %v3104_v23, %s3326_s13  ;;  %v1194_v31 = vpop.f32.mrb[25].mxu0 }
 0x19c   : > { %v3106_v35 = vadd.f32 %v1194_v31, %v3842_v17  ;;  %v2854_v36 = vpop.f32.mrb[26].mxu0 }
 0x19d   : > { %v3107_v37 = vadd.f32 %v2854_v36, %v3844_v18  ;;  %1420 = vrot.lane.b32.xlu0 %v3105_v29, %s3327_s14  ;;  %v1197_v38 = vpop.f32.mrb[27].mxu0 }
 0x19e   : > { %v3108_v40 = vadd.f32 %v1197_v38, %v3846_v20  ;;  %v3254_v38 = vld [vmem:[%s4184_s3] sm:$0xff]  }
 0x19f   : > { %1422 = vrot.lane.b32.xlu1 %v3107_v37, %s3327_s14 }
 0x1a1   : > { %1410 = vrot.lane.b32.xlu0 %v3106_v35, %s3328_s15 }
 0x1a2   : > { %v2857_v44 = vpop.f32.mrb[28].mxu0 }
 0x1a3   : > { %v3109_v46 = vadd.f32 %v2857_v44, %v3848_v24  ;;  %1412 = vrot.lane.b32.xlu1 %v3108_v40, %s3328_s15  ;;  %v1210_v47 = vpop.f32.mrb[29].mxu0  ;;  %v3332_v44 = vmov 0.0  }
 0x1a4   : > { %v3110_v51 = vadd.f32 %v1210_v47, %v3850_v21  ;;  %v2858_v52 = vpop.f32.mrb[30].mxu0 }
 0x1a5   : > { %v3111_v55 = vadd.f32 %v2858_v52, %v3852_v22  ;;  %1440 = vrot.lane.b32.xlu0 %v3109_v46, %s3329_s16  ;;  %v1213_v0 = vpop.f32.mrb[31].mxu0 }
 0x1a6   : > { %v3112_v9 = vadd.f32 %v1213_v0, %v3854_v61 }
 0x1a7   : > { %1442 = vrot.lane.b32.xlu1 %v3111_v55, %s3329_s16 }
 0x1a9   : > { %1430 = vrot.lane.b32.xlu0 %v3110_v51, %s3330_s17 }
 0x1aa   : > { %v2861_v10 = vpop.f32.mrb[32].mxu0 }
 0x1ab   : > { %v3113_v17 = vadd.f32 %v2861_v10, %v3856_v7  ;;  %1432 = vrot.lane.b32.xlu1 %v3112_v9, %s3330_s17  ;;  %v1226_v18 = vpop.f32.mrb[33].mxu0  ;;  %v3331_v7 = vmov 0   ;;  %v3255_v10 = vld [vmem:[%s4183_s2] sm:$0xff]  }
 0x1ac   : > { %v3114_v20 = vadd.f32 %v1226_v18, %v3858_v53  ;;  %v2862_v24 = vpop.f32.mrb[34].mxu0  ;;  %1548 = vmatprep.mubr.bf16.mxu1 %v3331_v7 }
 0x1ad   : > { %v3115_v21 = vadd.f32 %v2862_v24, %v3860_v54  ;;  %1452 = vrot.lane.b32.xlu0 %v3113_v17, %s3324_s8  ;;  %v1229_v22 = vpop.f32.mrb[35].mxu0 }
 0x1ae   : > { %1448 = vst.msk [vmem:[#allocation3 + $0x10] sm:$0xff] %vm317_vm0, %v3114_v20  ;;  %v3116_v61 = vadd.f32 %v1229_v22, %v3862_v56 }
 0x1af   : > { %1454 = vrot.lane.b32.xlu1 %v3115_v21, %s3324_s8  ;;  %s2609_s8 = sshll.u32 %s3396_s28, 4  ;;  %s3334_s28 = smov [#allocation4]  }
 0x1b0   : > { %1449 = vst.msk [vmem:[#allocation3 + $0x28] sm:$0xff] %vm317_vm0, %v3116_v61  ;;  %s4139_s17 = scalar_lea.hbm %s4188_s7, %s2609_s8  ;;  %s3264_s19 = sshll.u32 %s3334_s28, 4  ;;  %s3265_s19 = int_to_ptr.vmem [resolvable:$false] %s3264_s19 }
 0x1b1   : > { %s3266_s20 = scalar_lea.vmem %s3265_s19, 32 }
 0x1b2   : > { %v2865_v27 = vpop.f32.mrb[36].mxu0 }
 0x1b3   : > { %v3117_v53 = vadd.f32 %v2865_v27, %v3864_v57  ;;  %v1242_v28 = vpop.f32.mrb[37].mxu0 }
 0x1b4   : > { %v3118_v54 = vadd.f32 %v1242_v28, %v3866_v58  ;;  %v2866_v50 = vpop.f32.mrb[38].mxu0 }
 0x1b5   : > { %v3119_v1 = vadd.f32 %v2866_v50, %v3868_v14  ;;  %v1245_v39 = vpop.f32.mrb[39].mxu0 }
 0x1b6   : > { %v3120_v42 = vadd.f32 %v1245_v39, %v3870_v45  ;;  %1462 = vrot.lane.b32.xlu0 %v3118_v54, %s3326_s13 }
 0x1b8   : > { %1464 = vrot.lane.b32.xlu1 %v3120_v42, %s3326_s13 }
 0x1ba   : > { %1472 = vrot.lane.b32.xlu0 %v3117_v53, %s3325_s9 }
 0x1bc   : > { %1474 = vrot.lane.b32.xlu1 %v3119_v1, %s3325_s9  ;;  %s287_s9 = scalar_lea.vmem [#allocation4], %s286_s29 }
 0x1bd   : > { %s2464_s13 = sshll.u32 %s287_s9, 4  ;;  %s4141_s13 = int_to_ptr.vmem [resolvable:$true] %s2464_s13 }
 0x1be   : > { %s3260_s18 = scalar_lea.vmem %s4141_s13, 16  ;;  %p3267_p0 = scmp.lt.s32.totalorder %s4141_s13, %s3265_s19 }
 0x1bf   : > { %p3261_p11 = scmp.ne.s32.totalorder %s4141_s13, %s3260_s18  ;;  %p3268_p1 = scmp.lt.s32.totalorder %s3266_s20, %s3260_s18 }
 0x1c1   : > { %p3262_p12 = pnand %p3261_p11, %p3413_p5  ;;  %p3269_p2 = por %p3268_p1, %p3267_p0 }
 0x1c3   : > { %p3263_p13 = pneg %p3262_p12 }
 0x1c5   : > { %p3270_p3 = pnand %p3269_p2, %p3263_p13 }
 0x1dd   : > { %v1302_v56 = vpop.permute.xlu1 %1301 }
 0x1de   : > { %1308 = vst.msk [vmem:[#allocation3] sm:$0xff] %vm1307_vm1, %v1302_v56 }
 0x1e1   : > { %v1304_v57 = vpop.permute.xlu1 %1303 }
 0x1e2   : > { %1309 = vst.msk [vmem:[#allocation3 + $0x18] sm:$0xff] %vm1307_vm1, %v1304_v57 }
 0x1e5   : > { %v1324_v58 = vpop.permute.xlu0 %1323 }
 0x1e7   : > { %v1326_v14 = vpop.permute.xlu1 %1325 }
 0x1e9   : > { %v1313_v45 = vpop.permute.xlu0 %1312 }
 0x1ea   : > { %1319 = vst.msk [vmem:[#allocation3] sm:$0xff] %vm1318_vm2, %v1313_v45 }
 0x1eb   : > { %v1315_v12 = vpop.permute.xlu1 %1314  ;;  %1330 = vst.msk [vmem:[#allocation3] sm:$0xff] %vm1329_vm3, %v1324_v58 }
 0x1ec   : > { %1320 = vst.msk [vmem:[#allocation3 + $0x18] sm:$0xff] %vm1318_vm2, %v1315_v12 }
 0x1ed   : > { %v1346_v41 = vpop.permute.xlu0 %1345  ;;  %1331 = vst.msk [vmem:[#allocation3 + $0x18] sm:$0xff] %vm1329_vm3, %v1326_v14 }
 0x1ef   : > { %v1348_v60 = vpop.permute.xlu1 %1347 }
 0x1f1   : > { %v1335_v25 = vpop.permute.xlu0 %1334 }
 0x1f2   : > { %1341 = vst.msk [vmem:[#allocation3] sm:$0xff] %vm1340_vm4, %v1335_v25 }
 0x1f3   : > { %v1337_v16 = vpop.permute.xlu1 %1336  ;;  %1352 = vst.msk [vmem:[#allocation3] sm:$0xff] %vm1351_vm5, %v1346_v41 }
 0x1f4   : > { %1342 = vst.msk [vmem:[#allocation3 + $0x18] sm:$0xff] %vm1340_vm4, %v1337_v16  ;;  %v1844_v16 = vld [vmem:[%s4187_s6] sm:$0xff] }
 0x1f5   : > { %v1368_v34 = vpop.permute.xlu0 %1367  ;;  %1353 = vst.msk [vmem:[#allocation3 + $0x18] sm:$0xff] %vm1351_vm5, %v1348_v60 }
 0x1f7   : > { %v1370_v43 = vpop.permute.xlu1 %1369 }
 0x1f9   : > { %v1357_v48 = vpop.permute.xlu0 %1356 }
 0x1fa   : > { %1363 = vst.msk [vmem:[#allocation3] sm:$0xff] %vm1362_vm6, %v1357_v48 }
 0x1fb   : > { %1374 = vst.msk [vmem:[#allocation3] sm:$0xff] %vm1373_vm7, %v1368_v34  ;;  %v1359_v49 = vpop.permute.xlu1 %1358  ;;  %v1845_v34 = vld [vmem:[%s4187_s6 + $0x8] sm:$0xff] }
 0x1fc   : > { %1364 = vst.msk [vmem:[#allocation3 + $0x18] sm:$0xff] %vm1362_vm6, %v1359_v49  ;;  %v1863_v48 = vand.u32 4294901760, %v1845_v34 }
 0x1fd   : > { %1375 = vst.msk [vmem:[#allocation3 + $0x18] sm:$0xff] %vm1373_vm7, %v1370_v43  ;;  %v1860_v43 = vand.u32 4294901760, %v1844_v16 }
 0x1ff   : > { %v1381_v59 = vpop.permute.xlu0 %1380  ;;  %v4028_v49 = vpack.c.bf16 %v1863_v48, %v1860_v43 }
 0x200   : > { %1386 = vst.msk [vmem:[#allocation3 + $0x8] sm:$0xff] %vm1307_vm1, %v1381_v59  ;;  %v1846_v59 = vld [vmem:[%s4187_s6 + $0x10] sm:$0xff] }
 0x202   : > { %v1484_v35 = vld [vmem:[#allocation3] sm:$0xff] }
 0x203   : > { %v1383_v4 = vpop.permute.xlu0 %1382 }
 0x204   : > { %1387 = vst.msk [vmem:[#allocation3 + $0x20] sm:$0xff] %vm1307_vm1, %v1383_v4  ;;  %v1487_v23 = vld [vmem:[#allocation3 + $0x18] sm:$0xff] }
 0x205   : > { %v1490_v37 = vpack.c.bf16 %v1487_v23, %v1484_v35  ;;  %v1847_v4 = vld [vmem:[%s4187_s6 + $0x18] sm:$0xff] }
 0x207   : > { %v1401_v6 = vpop.permute.xlu0 %1400  ;;  %v1493_v20 = vunpack.c.l.bf16 %v1490_v37  ;;  %v1496_v24 = vunpack.c.h.bf16 %v1490_v37 }
 0x209   : > { %v1403_v30 = vpop.permute.xlu1 %1402  ;;  %v1499_v22 = vsub.f32 %v1484_v35, %v1493_v20  ;;  %v1502_v61 = vsub.f32 %v1487_v23, %v1496_v24 }
 0x20b   : > { %v1391_v8 = vpop.permute.xlu0 %1390  ;;  %v1505_v27 = vpack.c.bf16 %v1502_v61, %v1499_v22 }
 0x20c   : > { %1396 = vst.msk [vmem:[#allocation3 + $0x8] sm:$0xff] %vm1318_vm2, %v1391_v8 }
 0x20d   : > { %1406 = vst.msk [vmem:[#allocation3 + $0x8] sm:$0xff] %vm1329_vm3, %v1401_v6  ;;  %v1393_v32 = vpop.permute.xlu1 %1392  ;;  %v1866_v6 = vand.u32 4294901760, %v1846_v59 }
 0x20e   : > { %1397 = vst.msk [vmem:[#allocation3 + $0x20] sm:$0xff] %vm1318_vm2, %v1393_v32  ;;  %v1848_v32 = vld [vmem:[%s4187_s6 + $0x20] sm:$0xff] }
 0x20f   : > { %1407 = vst.msk [vmem:[#allocation3 + $0x20] sm:$0xff] %vm1329_vm3, %v1403_v30  ;;  %v1421_v33 = vpop.permute.xlu0 %1420  ;;  %v1869_v30 = vand.u32 4294901760, %v1847_v4 }
 0x211   : > { %v1423_v5 = vpop.permute.xlu1 %1422  ;;  %v4038_v8 = vpack.c.bf16 %v1869_v30, %v1866_v6 }
 0x213   : > { %v1411_v11 = vpop.permute.xlu0 %1410 }
 0x214   : > { %1416 = vst.msk [vmem:[#allocation3 + $0x8] sm:$0xff] %vm1340_vm4, %v1411_v11 }
 0x215   : > { %1426 = vst.msk [vmem:[#allocation3 + $0x8] sm:$0xff] %vm1351_vm5, %v1421_v33  ;;  %v1413_v19 = vpop.permute.xlu1 %1412  ;;  %v1849_v33 = vld [vmem:[%s4187_s6 + $0x28] sm:$0xff] }
 0x216   : > { %1417 = vst.msk [vmem:[#allocation3 + $0x20] sm:$0xff] %vm1340_vm4, %v1413_v19  ;;  %v1875_v11 = vand.u32 4294901760, %v1849_v33 }
 0x217   : > { %1427 = vst.msk [vmem:[#allocation3 + $0x20] sm:$0xff] %vm1351_vm5, %v1423_v5  ;;  %v1441_v13 = vpop.permute.xlu0 %1440  ;;  %v1872_v5 = vand.u32 4294901760, %v1848_v32 }
 0x219   : > { %v1443_v62 = vpop.permute.xlu1 %1442  ;;  %v4048_v19 = vpack.c.bf16 %v1875_v11, %v1872_v5 }
 0x21b   : > { %v1431_v63 = vpop.permute.xlu0 %1430 }
 0x21c   : > { %1436 = vst.msk [vmem:[#allocation3 + $0x8] sm:$0xff] %vm1362_vm6, %v1431_v63  ;;  %v1850_v63 = vld [vmem:[%s4187_s6 + $0x30] sm:$0xff] }
 0x21d   : > { %1446 = vst.msk [vmem:[#allocation3 + $0x8] sm:$0xff] %vm1373_vm7, %v1441_v13  ;;  %v1433_v2 = vpop.permute.xlu1 %1432  ;;  %v1954_v13 = vsub.f32 %v1844_v16, %v1860_v43 }
 0x21e   : > { %1437 = vst.msk [vmem:[#allocation3 + $0x20] sm:$0xff] %vm1362_vm6, %v1433_v2  ;;  %v1851_v2 = vld [vmem:[%s4187_s6 + $0x38] sm:$0xff] }
 0x21f   : > { %1447 = vst.msk [vmem:[#allocation3 + $0x20] sm:$0xff] %vm1373_vm7, %v1443_v62  ;;  %v1453_v3 = vpop.permute.xlu0 %1452  ;;  %v1961_v62 = vsub.f32 %v1845_v34, %v1863_v48  ;;  %v1955_v23 = vand.u32 4294901760, %v1954_v13 }
 0x220   : > { %1458 = vst.msk [vmem:[#allocation3 + $0x10] sm:$0xff] %vm1307_vm1, %v1453_v3  ;;  %v1878_v3 = vand.u32 4294901760, %v1850_v63 }
 0x221   : > { %v1455_v15 = vpop.permute.xlu1 %1454  ;;  %v4071_v16 = vpack.c.bf16 %v1961_v62, %v1954_v13 }
 0x222   : > { %1459 = vst.msk [vmem:[#allocation3 + $0x28] sm:$0xff] %vm1307_vm1, %v1455_v15  ;;  %v1881_v15 = vand.u32 4294901760, %v1851_v2 }
 0x224   : > { %v1485_v26 = vld [vmem:[#allocation3 + $0x8] sm:$0xff]  ;;  %v2003_v22 = vsub.f32 %v1851_v2, %v1881_v15 }
 0x226   : > { %v1488_v29 = vld [vmem:[#allocation3 + $0x20] sm:$0xff] }
 0x227   : > { %v1491_v31 = vpack.c.bf16 %v1488_v29, %v1485_v26 }
 0x228   : > { %v1463_v36 = vpop.permute.xlu0 %1462 }
 0x229   : > { %1468 = vst.msk [vmem:[#allocation3 + $0x10] sm:$0xff] %vm1318_vm2, %v1463_v36  ;;  %1516 = vmatprep.subr.bf16.mxu1 %v1491_v31  ;;  %v1494_v0 = vunpack.c.l.bf16 %v1491_v31  ;;  %v1497_v9 = vunpack.c.h.bf16 %v1491_v31  ;;  %v1968_v36 = vsub.f32 %v1846_v59, %v1866_v6 }
 0x22a   : > { %1517 = vmatpush1.bf16.msra.mxu1 %v1490_v37  ;;  %v1465_v40 = vpop.permute.xlu1 %1464 }
 0x22b   : > { %1469 = vst.msk [vmem:[#allocation3 + $0x28] sm:$0xff] %vm1318_vm2, %v1465_v40  ;;  %2867 = vmatprep.subr.bf16.mxu1 %v3332_v44  ;;  %v1500_v17 = vsub.f32 %v1485_v26, %v1494_v0  ;;  %v1503_v18 = vsub.f32 %v1488_v29, %v1497_v9  ;;  %v1962_v26 = vand.u32 4294901760, %v1961_v62  ;;  %v4058_v29 = vpack.c.bf16 %v1881_v15, %v1878_v3 }
 0x22c   : > { %v1473_v46 = vpop.permute.xlu0 %1472 }
 0x22d   : > { %1478 = vst.msk [vmem:[#allocation3 + $0x10] sm:$0xff] %vm1329_vm3, %v1473_v46  ;;  %2602 = vmatmul.mubr.msk.bf16.vlgmr.msra.gmra.mrb[24].mxu1 %vm317_vm0, %v3254_v38  ;;  %v1506_v21 = vpack.c.bf16 %v1503_v18, %v1500_v17  ;;  %v1963_v35 = vsub.f32 %v1961_v62, %v1962_v26  ;;  %v4079_v59 = vpack.c.bf16 %v1962_v26, %v1955_v23 }
 0x22e   : > { %v1475_v47 = vpop.permute.xlu1 %1474  ;;  %2869 = vmatprep.mubr.msk.bf16.mxu1 %vm3333_vm8, %v3332_v44 }
 0x22f   : > { %1479 = vst.msk [vmem:[#allocation3 + $0x28] sm:$0xff] %vm1329_vm3, %v1475_v47  ;;  %v1964_v40 = vand.u32 4294901760, %v1963_v35 }
 0x234   : > { %v1486_v51 = vld [vmem:[#allocation3 + $0x10] sm:$0xff] }
 0x236   : > { %v1489_v52 = vld [vmem:[#allocation3 + $0x28] sm:$0xff] }
 0x237   : > { %v1492_v55 = vpack.c.bf16 %v1489_v52, %v1486_v51 }
 0x239   : > { %2868 = vmatpush3.bf16.msra.mxu1 %v1492_v55  ;;  %v1495_v53 = vunpack.c.l.bf16 %v1492_v55  ;;  %v1498_v28 = vunpack.c.h.bf16 %v1492_v55 }
 0x23a   : > { %1608 = vmatprep.subr.bf16.mxu1 %v1491_v31  ;;  %v1956_v31 = vsub.f32 %v1954_v13, %v1955_v23 }
 0x23b   : > { %v1501_v54 = vsub.f32 %v1486_v51, %v1495_v53  ;;  %v1504_v50 = vsub.f32 %v1489_v52, %v1498_v28  ;;  %v1982_v52 = vsub.f32 %v1848_v32, %v1872_v5 }
 0x23c   : > { %2870 = vmatmul.mubr.msk.bf16.vlgmr.msra.gmra.mrb[28].mxu1 %vm317_vm0, %v3254_v38  ;;  %v1957_v38 = vand.u32 4294901760, %v1956_v31 }
 0x23d   : > { %1609 = vmatpush1.bf16.msra.mxu1 %v1490_v37  ;;  %1640 = vmatprep.mubr.bf16.mxu1 %v3331_v7  ;;  %v1507_v1 = vpack.c.bf16 %v1504_v50, %v1501_v54  ;;  %v1975_v37 = vsub.f32 %v1847_v4, %v1869_v30  ;;  %v2004_v54 = vand.u32 4294901760, %v2003_v22 }
 0x23e   : > { %2873 = vmatprep.subr.bf16.mxu1 %v3332_v44  ;;  %v4062_v47 = vpack.c.bf16 %v1964_v40, %v1957_v38 }
 0x23f   : > { %v1976_v46 = vand.u32 4294901760, %v1975_v37  ;;  %v4073_v34 = vpack.c.bf16 %v1975_v37, %v1968_v36 }
 0x241   : > { %v1977_v0 = vsub.f32 %v1975_v37, %v1976_v46 }
 0x243   : > { %v1978_v18 = vand.u32 4294901760, %v1977_v0 }
 0x244   : > { %2605 = vmatmul.mubr.msk.bf16.vlgmr.msra.gmra.mrb[24].mxu1 %vm317_vm0, %v3255_v10 }
 0x245   : > { %2874 = vmatpush3.bf16.msra.mxu1 %v1492_v55  ;;  %2875 = vmatprep.mubr.msk.bf16.mxu1 %vm3333_vm8, %v3332_v44  ;;  %v1989_v55 = vsub.f32 %v1849_v33, %v1875_v11 }
 0x246   : > { %1692 = vmatprep.subr.bf16.mxu1 %v1506_v21  ;;  %v1996_v21 = vsub.f32 %v1850_v63, %v1878_v3 }
 0x247   : > { %v1990_v17 = vand.u32 4294901760, %v1989_v55  ;;  %v4075_v43 = vpack.c.bf16 %v1989_v55, %v1982_v52 }
 0x248   : > { %v1997_v28 = vand.u32 4294901760, %v1996_v21  ;;  %v4077_v48 = vpack.c.bf16 %v2003_v22, %v1996_v21 }
 0x249   : > { %v1991_v24 = vsub.f32 %v1989_v55, %v1990_v17 }
 0x24a   : > { %v4085_v30 = vpack.c.bf16 %v2004_v54, %v1997_v28 }
 0x24b   : > { %v1992_v53 = vand.u32 4294901760, %v1991_v24 }
 0x24c   : > { %2876 = vmatmul.mubr.msk.bf16.vlgmr.msra.gmra.mrb[28].mxu1 %vm317_vm0, %v3255_v10 }
 0x24d   : > { %1693 = vmatpush1.bf16.msra.mxu1 %v1505_v27  ;;  %1724 = vmatprep.mubr.bf16.mxu1 %v3331_v7 }
 0x24e   : > { %2879 = vmatprep.subr.bf16.mxu1 %v3332_v44 }
 0x254   : > { %2607 = vmatmul.mubr.msk.bf16.vlgmr.msra.gmra.mrb[24].mxu1 %vm317_vm0, %v3255_v10 }
 0x255   : > { %2880 = vmatpush3.bf16.msra.mxu1 %v1507_v1  ;;  %2881 = vmatprep.mubr.msk.bf16.mxu1 %vm3333_vm8, %v3332_v44  ;;  %v1969_v44 = vand.u32 4294901760, %v1968_v36  ;;  %v1998_v1 = vsub.f32 %v1996_v21, %v1997_v28 }
 0x256   : > { %3000 = vmatprep.subr.bf16.mxu1 %v4028_v49 }
 0x257   : > { %v1970_v51 = vsub.f32 %v1968_v36, %v1969_v44  ;;  %v4081_v4 = vpack.c.bf16 %v1976_v46, %v1969_v44 }
 0x259   : > { %v1971_v9 = vand.u32 4294901760, %v1970_v51 }
 0x25b   : > { %v4065_v61 = vpack.c.bf16 %v1978_v18, %v1971_v9 }
 0x25c   : > { %2882 = vmatmul.mubr.msk.bf16.vlgmr.msra.gmra.mrb[28].mxu1 %vm317_vm0, %v3255_v10  ;;  %v1983_v10 = vand.u32 4294901760, %v1982_v52 }
 0x25d   : > { %3002 = vmatpush3.bf16.msra.mxu1 %v4028_v49 }
 0x25e   : > { %3004 = vmatprep.subr.bf16.mxu1 %v4038_v8  ;;  %v1984_v20 = vsub.f32 %v1982_v52, %v1983_v10  ;;  %v4083_v6 = vpack.c.bf16 %v1990_v17, %v1983_v10 }
 0x260   : > { %v1985_v27 = vand.u32 4294901760, %v1984_v20 }
 0x261   : > { %3006 = vmatpush3.bf16.msra.mxu1 %v4038_v8 }
 0x262   : > { %3008 = vmatprep.subr.bf16.mxu1 %v4048_v19  ;;  %v4067_v50 = vpack.c.bf16 %v1992_v53, %v1985_v27 }
 0x265   : > { %3010 = vmatpush3.bf16.msra.mxu1 %v4048_v19 }
 0x266   : > { %3012 = vmatprep.subr.bf16.mxu1 %v4058_v29 }
 0x269   : > { %3014 = vmatpush3.bf16.msra.mxu1 %v4058_v29 }
 0x26a   : > { %3016 = vmatprep.subr.bf16.mxu1 %v4062_v47 }
 0x327   : > { %v3988_v39 = vpop.f32.mrb[24].mxu1 }
 0x328   : > { %v3992_v42 = vmul.f32 %v3988_v39, %v3988_v39  ;;  %v1728_v56 = vpop.f32.mrb[25].mxu1 }
 0x329   : > { %v3994_v57 = vpop.f32.mrb[26].mxu1 }
 0x32a   : > { %v3997_v7 = vsub.f32 %v1728_v56, %v3992_v42  ;;  %1808 = vrot.lane.b32.xlu0 %v3992_v42, %s3328_s15  ;;  %v4003_v58 = vmul.f32 %v3994_v57, %v3994_v57  ;;  %v1732_v14 = vpop.f32.mrb[27].mxu1  ;;  %v2005_v56 = vsub.f32 %v2003_v22, %v2004_v54 }
 0x32c   : > { %1822 = vrot.lane.b32.xlu1 %v3997_v7, %s3328_s15  ;;  %v4008_v45 = vsub.f32 %v1732_v14, %v4003_v58  ;;  %v1999_v14 = vand.u32 4294901760, %v1998_v1 }
 0x32e   : > { %1810 = vrot.lane.b32.xlu0 %v4003_v58, %s3328_s15 }
 0x32f   : > { %v4012_v12 = vpop.f32.mrb[28].mxu1 }
 0x330   : > { %1824 = vrot.lane.b32.xlu1 %v4008_v45, %s3328_s15  ;;  %v2883_v41 = vpop.f32.mrb[29].mxu1 }
 0x331   : > { %v4016_v60 = vpop.f32.mrb[30].mxu1  ;;  %v2006_v41 = vand.u32 4294901760, %v2005_v56 }
 0x332   : > { %1786 = vrot.lane.b32.xlu0 %v3988_v39, %s3328_s15  ;;  %v2884_v25 = vpop.f32.mrb[31].mxu1 }
 0x333   : > { %v4069_v25 = vpack.c.bf16 %v2006_v41, %v1999_v14 }
 0x334   : > { %1788 = vrot.lane.b32.xlu1 %v3994_v57, %s3328_s15  ;;  %s2452_s15 = scalar_lea.sflag [#allocation5], %s286_s29 }
 0x39c   : > { %v1809_v32 = vpop.permute.xlu0 %1808 }
 0x39d   : > { %v1814_v33 = vadd.f32 %v1809_v32, %v3992_v42 }
 0x39e   : > { %v1823_v5 = vpop.permute.xlu1 %1822 }
 0x39f   : > { %v1828_v11 = vadd.f32 %v1823_v5, %v3997_v7  ;;  %v1816_v62 = vadd.f32 0.0001, %v1814_v33 }
 0x3a0   : > { %v1811_v13 = vpop.permute.xlu0 %1810 }
 0x3a1   : > { %v1830_v63 = vadd.f32 0.0009, %v1828_v11  ;;  %v1815_v2 = vadd.f32 %v1811_v13, %v4003_v58 }
 0x3a2   : > { %v1825_v3 = vpop.permute.xlu1 %1824 }
 0x3a3   : > { %v1832_v15 = vmul.f32 %v1830_v63, %v1816_v62  ;;  %v1829_v23 = vadd.f32 %v1825_v3, %v4008_v45  ;;  %v1817_v31 = vadd.f32 0.0001, %v1815_v2 }
 0x3a4   : > { %v1787_v26 = vpop.permute.xlu0 %1786 }
 0x3a5   : > { %3256 = vrcp.f32 %v1832_v15  ;;  %v1831_v35 = vadd.f32 0.0009, %v1829_v23  ;;  %v1792_v36 = vmul.f32 %v1787_v26, %v3988_v39 }
 0x3a6   : > { %v1789_v37 = vpop.permute.xlu1 %1788 }
 0x3a7   : > { %v1833_v42 = vmul.f32 %v1831_v35, %v1817_v31  ;;  %v1794_v38 = vmul.f32 2.0, %v1792_v36  ;;  %v1798_v7 = vsub.f32 %v4012_v12, %v1792_v36  ;;  %v1793_v40 = vmul.f32 %v1789_v37, %v3994_v57 }
 0x3a9   : > { %3258 = vrcp.f32 %v1833_v42  ;;  %v1800_v44 = vmul.f32 2.0, %v1798_v7  ;;  %v1795_v58 = vmul.f32 2.0, %v1793_v40  ;;  %v1799_v46 = vsub.f32 %v4016_v60, %v1793_v40 }
 0x3aa   : > { %v1796_v51 = vadd.f32 0.0001, %v1794_v38 }
 0x3ab   : > { %v1802_v45 = vadd.f32 0.0009, %v1800_v44  ;;  %v1801_v52 = vmul.f32 2.0, %v1799_v46  ;;  %v1797_v0 = vadd.f32 0.0001, %v1795_v58 }
 0x3ad   : > { %v1804_v55 = vmul.f32 %v1802_v45, %v1796_v51  ;;  %v1803_v9 = vadd.f32 0.0009, %v1801_v52 }
 0x3af   : > { %v3257_v10 = vpop.eup %3256  ;;  %v1805_v17 = vmul.f32 %v1803_v9, %v1797_v0 }
 0x3b0   : > { %v1836_v39 = vmul.f32 %v3257_v10, %v1832_v15 }
 0x3b2   : > { %v1838_v18 = vsub.f32 2.0, %v1836_v39 }
 0x3b3   : > { %v3259_v20 = vpop.eup %3258 }
 0x3b4   : > { %v1840_v24 = vmul.f32 %v3257_v10, %v1838_v18  ;;  %v1837_v12 = vmul.f32 %v3259_v20, %v1833_v42 }
 0x3b6   : > { %v1839_v57 = vsub.f32 2.0, %v1837_v12  ;;  %v1842_v21 = vmul.f32 %v1840_v24, %v1804_v55 }
 0x3b8   : > { %v1841_v22 = vmul.f32 %v3259_v20, %v1839_v57  ;;  %v1854_v27 = vsel %vm1852_vm9, %v1842_v21, 0 }
 0x3b9   : > { %v1932_v53 = vand.u32 4294901760, %v1854_v27 }
 0x3ba   : > { %v1843_v60 = vmul.f32 %v1841_v22, %v1805_v17 }
 0x3bb   : > { %v1933_v28 = vsub.f32 %v1854_v27, %v1932_v53 }
 0x3bc   : > { %v1857_v54 = vsel %vm1852_vm9, %v1843_v60, 0 }
 0x3bd   : > { %v1942_v1 = vand.u32 4294901760, %v1857_v54  ;;  %v1934_v56 = vand.u32 4294901760, %v1933_v28 }
 0x3bf   : > { %v1943_v14 = vsub.f32 %v1857_v54, %v1942_v1  ;;  %v1935_v41 = vsub.f32 %v1933_v28, %v1934_v56 }
 0x3c1   : > { %v1936_v32 = vand.u32 4294901760, %v1935_v41  ;;  %v1944_v33 = vand.u32 4294901760, %v1943_v14 }
 0x3c3   : > { %2901 = vmatprep.mubr.f32.mxu1 %v1936_v32  ;;  %v1945_v5 = vsub.f32 %v1943_v14, %v1944_v33 }
 0x3c5   : > { %v1946_v11 = vand.u32 4294901760, %v1945_v5 }
 0x3c7   : > { %2902 = vmatmul.mubr.f32.vlgmr.msra.gmra.mrb[32].mxu1 %v1946_v11 }
 0x3c8   : > { %3018 = vmatpush3.bf16.msra.mxu1 %v4062_v47  ;;  %2920 = vmatprep.mubr.f32.mxu1 %v1932_v53 }
 0x3c9   : > { %3020 = vmatprep.subr.bf16.mxu1 %v4065_v61 }
 0x3cc   : > { %3022 = vmatpush3.bf16.msra.mxu1 %v4065_v61 }
 0x3cd   : > { %3024 = vmatprep.subr.bf16.mxu1 %v4067_v50 }
 0x3d0   : > { %3026 = vmatpush3.bf16.msra.mxu1 %v4067_v50 }
 0x3d1   : > { %3028 = vmatprep.subr.bf16.mxu1 %v4069_v25 }
 0x3d4   : > { %3030 = vmatpush3.bf16.msra.mxu1 %v4069_v25 }
 0x3d5   : > { %3032 = vmatprep.subr.bf16.mxu1 %v4071_v16 }
 0x3d7   : > { %2921 = vmatmul.mubr.f32.vlgmr.msra.gmra.mrb[32].mxu1 %v1942_v1 }
 0x3d8   : > { %3034 = vmatpush3.bf16.msra.mxu1 %v4071_v16  ;;  %2939 = vmatprep.mubr.f32.mxu1 %v1933_v28 }
 0x3d9   : > { %3036 = vmatprep.subr.bf16.mxu1 %v4073_v34 }
 0x3dc   : > { %3038 = vmatpush3.bf16.msra.mxu1 %v4073_v34 }
 0x3dd   : > { %3040 = vmatprep.subr.bf16.mxu1 %v4075_v43 }
 0x3e0   : > { %3042 = vmatpush3.bf16.msra.mxu1 %v4075_v43 }
 0x3e1   : > { %3044 = vmatprep.subr.bf16.mxu1 %v4077_v48 }
 0x3e4   : > { %3046 = vmatpush3.bf16.msra.mxu1 %v4077_v48 }
 0x3e5   : > { %3048 = vmatprep.subr.bf16.mxu1 %v4028_v49 }
 0x3e7   : > { %2940 = vmatmul.mubr.f32.vlgmr.msra.gmra.mrb[32].mxu1 %v1943_v14 }
 0x3e8   : > { %3050 = vmatpush3.bf16.msra.mxu1 %v4028_v49  ;;  %2958 = vmatprep.mubr.f32.mxu1 %v1934_v56 }
 0x3e9   : > { %3052 = vmatprep.subr.bf16.mxu1 %v4038_v8 }
 0x3ec   : > { %3054 = vmatpush3.bf16.msra.mxu1 %v4038_v8 }
 0x3ed   : > { %3056 = vmatprep.subr.bf16.mxu1 %v4048_v19 }
 0x3f0   : > { %3058 = vmatpush3.bf16.msra.mxu1 %v4048_v19 }
 0x3f1   : > { %3060 = vmatprep.subr.bf16.mxu1 %v4058_v29 }
 0x3f4   : > { %3062 = vmatpush3.bf16.msra.mxu1 %v4058_v29 }
 0x3f5   : > { %3064 = vmatprep.subr.bf16.mxu1 %v4079_v59 }
 0x3f7   : > { %2959 = vmatmul.mubr.f32.vlgmr.msra.gmra.mrb[32].mxu1 %v1944_v33 }
 0x3f8   : > { %3066 = vmatpush3.bf16.msra.mxu1 %v4079_v59  ;;  %2977 = vmatprep.mubr.f32.mxu1 %v1932_v53 }
 0x3f9   : > { %3068 = vmatprep.subr.bf16.mxu1 %v4081_v4 }
 0x3fc   : > { %3070 = vmatpush3.bf16.msra.mxu1 %v4081_v4 }
 0x3fd   : > { %3072 = vmatprep.subr.bf16.mxu1 %v4083_v6 }
 0x400   : > { %3074 = vmatpush3.bf16.msra.mxu1 %v4083_v6 }
 0x401   : > { %3076 = vmatprep.subr.bf16.mxu1 %v4085_v30 }
 0x404   : > { %3078 = vmatpush3.bf16.msra.mxu1 %v4085_v30 }
 0x405   : > { %3080 = vmatprep.subr.bf16.mxu1 %v4028_v49 }
 0x407   : > { %2978 = vmatmul.mubr.f32.vlgmr.msra.gmra.mrb[32].mxu1 %v1942_v1 }
 0x408   : > { %3082 = vmatpush3.bf16.msra.mxu1 %v4028_v49  ;;  %2996 = vmatprep.mubr.f32.mxu1 %v1932_v53 }
 0x409   : > { %3084 = vmatprep.subr.bf16.mxu1 %v4038_v8 }
 0x40c   : > { %3086 = vmatpush3.bf16.msra.mxu1 %v4038_v8 }
 0x40d   : > { %3088 = vmatprep.subr.bf16.mxu1 %v4048_v19 }
 0x410   : > { %3090 = vmatpush3.bf16.msra.mxu1 %v4048_v19 }
 0x411   : > { %3092 = vmatprep.subr.bf16.mxu1 %v4058_v29 }
 0x414   : > { %3094 = vmatpush3.bf16.msra.mxu1 %v4058_v29 }
 0x417   : > { %2997 = vmatmul.mubr.f32.vlgmr.msra.gmra.mrb[32].mxu1 %v1942_v1 }
 0x4ea   : > { %v2998_v47 = vpop.f32.mrb[32].mxu1 }
 0x4eb   : > { %v2441_v61 = vsel %vm2439_vm10, %v2998_v47, 0.0  ;;  %v2429_v49 = vpop.f32.mrb[33].mxu1 }
 0x4ec   : > { %v2440_v50 = vsel %vm2439_vm10, %v2429_v49, 0.0 }
 0x4ed   : > { %v2442_v25 = vadd.f32 %v2441_v61, %v2440_v50 }
 0x4ef   : > { %v2443_v16 = vrot.slane %v2442_v25, 4 }
 0x4f1   : > { %v2444_v8 = vadd.f32 %v2443_v16, %v2442_v25 }
 0x4f3   : > { %v2445_v34 = vrot.slane %v2444_v8, 2 }
 0x4f5   : > { %v2446_v43 = vadd.f32 %v2445_v34, %v2444_v8 }
 0x4f7   : > { %v2447_v19 = vrot.slane %v2446_v43, 1 }
 0x4f9   : > { %v2448_v48 = vadd.f32 %v2447_v19, %v2446_v43 }
 0x4fb   : > { %2450 = vst.msk [vmem:[%s287_s9] sm:$0x1] %vm2449_vm11, %v2448_v48 }
 0x4fc   : > { %3273 = shalt.err (!%p3270_p3)
}
 0x4fd   : > { %s3274_s21 = scalar_lea.hbm %s4139_s17, 16  ;;  %s3278_s29 = scalar_lea.hbm %s4188_s7, 32 }
 0x4fe   : > { %p3275_p4 = scmp.ne.s32.totalorder %s4139_s17, %s3274_s21  ;;  %p3279_p9 = scmp.lt.u32.totalorder %s4139_s17, %s4188_s7 }
 0x4ff   : > { %p3280_p10 = scmp.lt.u32.totalorder %s3278_s29, %s3274_s21  ;;  %p3282_p12 = scmp.lt.u32.totalorder %s3274_s21, %s4139_s17 }
 0x500   : > { %p3276_p7 = pnand %p3275_p4, %p3413_p5 }
 0x501   : > { %p3281_p11 = por %p3280_p10, %p3279_p9 }
 0x502   : > { %p3277_p8 = pneg %p3276_p7 }
 0x503   : > { %p3283_p13 = por %p3282_p12, %p3281_p11 }
 0x505   : > { %p3284_p0 = pnand %p3283_p13, %p3277_p8 }
 0x507   : > { %3287 = shalt.err (!%p3284_p0)
}
 0x508   : > { %3203 = dma.vmem_to_hbm [thread:$0]  (%p3413_p5), %s4141_s13, 16, %s4139_s17, %s2452_s15  }
 0x509 PF: > { %p3209_p1 = scmp.ge.s32.totalorder %s3322_s27, 2  ;;  %s2476_s14 = sand.u32 1, %s3310_s24  }
 0x50a   : > { %s2477_s16 = scalar_lea.sflag [#allocation5], %s2476_s14 }
 0x50b   : > { %p3206_p2 = pnand %p3209_p1, %p3417_p6 }
 0x50d   : > { %3305 = dma.done.wait (!%p3206_p2), %s2477_s16, 16  }
 0x50e   : > { %3307 = vsyncadd (!%p3206_p2), %s2477_s16, 4294967280  ;;  %p17_p3 = scmp.ge.s32.totalorder %s3400_s30, 4   ;;  %s4217_s24 = smov %s3314_s25 }
 0x50f   : > { %s4218_s25 = smov %s3318_s26  ;;  %s4219_s26 = smov %s3411_s10 }
 0x510   : > { %s4220_s27 = smov %s3400_s30  ;;  %19 = sbr.rel (!%p17_p3) target bundleno = 3 (0x3), region = 86 }
 0x517   :  { %2481 = vsyncpa [#allocation5], 1 }
 0x518   :  { %2483 = vsyncpa [#allocation5 + $0x1], 1 }

</bundles_post_ra>
